<compile_context>
chip_gen: v7x
topology: tpu7x:2x2x1
jax: 0.10.0
libtpu: 0.0.40
codegen_flags: <defaults>
</compile_context>

<pallas_src>
import functools

import jax
import jax.numpy as jnp
from jax import lax
from jax.experimental import pallas as pl
from jax.experimental.pallas import tpu as pltpu


def _round_up(x, m):
    return ((x + m - 1) // m) * m


def _sym_loss_kernel(planes_ref, quats_ref, pts_ref, near_ref, out_ref,
                     *, n_true, b_true, hasaxis, need_mask):
    """One N-chunk of the symmetric-loss reduction, vectorized over batch.

    planes_ref : VMEM (3, 4, Bp, 1)  plane coeffs (a,b,c,d) per hypothesis, as (Bp,1) columns
    quats_ref  : VMEM (3, 4, Bp, 1)  quaternions (w,x,y,z) per hypothesis, as (Bp,1) columns
    pts_ref    : VMEM (3, Bp, Nc)    px / py / pz slabs (batch on sublanes, points on lanes)
    near_ref   : VMEM (3, Bp, Nc)    nearest-surface-point slabs
    out_ref    : VMEM (1, Bp, C)     per-batch partial sums for this chunk
                                     C = 6 (plane x/y/z, rot x/y/z) or 3 (no axis)
    """
    c = pl.program_id(0)
    Bp, Nc = pts_ref.shape[1], pts_ref.shape[2]

    px, py, pz = pts_ref[0], pts_ref[1], pts_ref[2]        # (Bp, Nc)
    nx, ny, nz = near_ref[0], near_ref[1], near_ref[2]     # (Bp, Nc)

    if need_mask:
        col = c * Nc + lax.broadcasted_iota(jnp.int32, (Bp, Nc), 1)
        row = lax.broadcasted_iota(jnp.int32, (Bp, Nc), 0)
        maskf = ((col < n_true) & (row < b_true)).astype(jnp.float32)
    else:
        maskf = None

    sums = []

    # ---------------- planar reflections (x / y / z hypotheses) ----------------
    for t in range(3):
        a = planes_ref[t, 0]
        bb = planes_ref[t, 1]
        cc = planes_ref[t, 2]
        d = planes_ref[t, 3]                                # (Bp, 1)
        scale = 2.0 / (a * a + bb * bb + cc * cc + 1e-12)   # (Bp, 1)
        k = scale * (a * px + bb * py + cc * pz + d)        # (Bp, Nc)
        dx = (px - k * a) - nx
        dy = (py - k * bb) - ny
        dz = (pz - k * cc) - nz
        sq = dx * dx + dy * dy + dz * dz
        if maskf is not None:
            sq = sq * maskf
        sums.append(jnp.sum(sq, axis=-1, keepdims=True))    # (Bp, 1)

    # ---------------- quaternion rotations (x / y / z hypotheses) ----------------
    if hasaxis:
        for t in range(3):
            qw = quats_ref[t, 0]
            qi = quats_ref[t, 1]
            qj = quats_ref[t, 2]
            qk = quats_ref[t, 3]                            # (Bp, 1)
            qn = lax.rsqrt(qw * qw + qi * qi + qj * qj + qk * qk + 1e-12)
            qw, qi, qj, qk = qw * qn, qi * qn, qj * qn, qk * qn
            r00 = 1.0 - 2.0 * (qj * qj + qk * qk)
            r01 = 2.0 * (qi * qj - qw * qk)
            r02 = 2.0 * (qi * qk + qw * qj)
            r10 = 2.0 * (qi * qj + qw * qk)
            r11 = 1.0 - 2.0 * (qi * qi + qk * qk)
            r12 = 2.0 * (qj * qk - qw * qi)
            r20 = 2.0 * (qi * qk - qw * qj)
            r21 = 2.0 * (qj * qk + qw * qi)
            r22 = 1.0 - 2.0 * (qi * qi + qj * qj)
            ddx = (r00 * px + r01 * py + r02 * pz) - nx
            ddy = (r10 * px + r11 * py + r12 * pz) - ny
            ddz = (r20 * px + r21 * py + r22 * pz) - nz
            sq = ddx * ddx + ddy * ddy + ddz * ddz
            if maskf is not None:
                sq = sq * maskf
            sums.append(jnp.sum(sq, axis=-1, keepdims=True))

    out_ref[0] = jnp.concatenate(sums, axis=-1)             # (Bp, C)


def _regularization_loss(plane_x, plane_y, plane_z, rot_x, rot_y, rot_z, hasaxis):
    """PRS-Net regularization term (tiny 3x3 per-batch math — plain JAX glue)."""
    n = jnp.stack([plane_x[..., :3], plane_y[..., :3], plane_z[..., :3]], axis=1)
    n = n / (jnp.linalg.norm(n, axis=-1, keepdims=True) + 1e-12)
    a = jnp.matmul(n, jnp.swapaxes(n, -1, -2)) - jnp.eye(3, dtype=n.dtype)
    loss = jnp.mean(jnp.sum(a * a, axis=(-1, -2)))
    if hasaxis:
        ax = jnp.stack([rot_x[..., 1:4], rot_y[..., 1:4], rot_z[..., 1:4]], axis=1)
        ax = ax / (jnp.linalg.norm(ax, axis=-1, keepdims=True) + 1e-12)
        m = jnp.matmul(ax, jnp.swapaxes(ax, -1, -2)) - jnp.eye(3, dtype=ax.dtype)
        loss = loss + jnp.mean(jnp.sum(m * m, axis=(-1, -2)))
    return loss


@functools.partial(jax.jit, static_argnames=("weight", "hasaxis"))
def all_loss(points, near_point, plane_x, plane_y, plane_z,
             rot_x, rot_y, rot_z, *, weight=25.0, hasaxis=True):
    """Mirror of AllLoss.forward with use_chamfer=False.

    points, near_point : (B, N, 3) float32
    plane_* , rot_*    : (B, 4)    float32
    returns            : (1,)      float32
    """
    points = points.astype(jnp.float32)
    near_point = near_point.astype(jnp.float32)
    B, N, _ = points.shape

    # ---- layout / tiling decisions (trace-time Python) ----
    Bp = _round_up(B, 8)                                   # batch on sublanes
    # chunk cap: one (3, Bp, Nc) f32 input chunk <= ~2 MiB (safe with 2 inputs x
    # 2 pipeline buffers even on v7x's 64 MiB VMEM), multiple of 128 lanes.
    cap = max(128, (((2 * 1024 * 1024) // (3 * Bp * 4)) // 128) * 128)
    Np = _round_up(N, 128)
    nc = min(Np, cap)
    Np = _round_up(Np, nc)
    n_chunks = Np // nc
    n_cols = 6 if hasaxis else 3
    need_mask = (Bp != B) or (Np != N)

    # TODO(synk): the (B,N,3)->(3,Bp,Np) relayout below could be removed if the
    # caller supplied coordinate-major points; kept to preserve the (B,N,3) API.
    pts = jnp.pad(jnp.transpose(points, (2, 0, 1)),
                  ((0, 0), (0, Bp - B), (0, Np - N)))       # (3, Bp, Np)
    near = jnp.pad(jnp.transpose(near_point, (2, 0, 1)),
                   ((0, 0), (0, Bp - B), (0, Np - N)))      # (3, Bp, Np)

    planes = jnp.stack([plane_x, plane_y, plane_z], axis=0).astype(jnp.float32)  # (3, B, 4)
    quats = jnp.stack([rot_x, rot_y, rot_z], axis=0).astype(jnp.float32)         # (3, B, 4)
    planes_b = jnp.pad(jnp.transpose(planes, (0, 2, 1)),
                       ((0, 0), (0, 0), (0, Bp - B)))[..., None]  # (3, 4, Bp, 1)
    quats_b = jnp.pad(jnp.transpose(quats, (0, 2, 1)),
                      ((0, 0), (0, 0), (0, Bp - B)))[..., None]   # (3, 4, Bp, 1)

    kernel = functools.partial(_sym_loss_kernel, n_true=N, b_true=B,
                               hasaxis=hasaxis, need_mask=need_mask)

    partials = pl.pallas_call(
        kernel,
        out_shape=jax.ShapeDtypeStruct((n_chunks, Bp, n_cols), jnp.float32),
        grid=(n_chunks,),
        in_specs=[
            pl.BlockSpec((3, 4, Bp, 1), lambda c: (0, 0, 0, 0)),   # planes (resident)
            pl.BlockSpec((3, 4, Bp, 1), lambda c: (0, 0, 0, 0)),   # quats  (resident)
            pl.BlockSpec((3, Bp, nc), lambda c: (0, 0, c)),        # points chunk
            pl.BlockSpec((3, Bp, nc), lambda c: (0, 0, c)),        # near-point chunk
        ],
        out_specs=pl.BlockSpec((1, Bp, n_cols), lambda c: (c, 0, 0)),
        compiler_params=pltpu.CompilerParams(
            dimension_semantics=("parallel",)),                    # chunks are independent
    )(planes_b, quats_b, pts, near)

    # mean over batch of per-batch mean over points == global sum / (B*N)
    sym_terms = jnp.sum(partials, axis=(0, 1)) / jnp.float32(B * N)   # (n_cols,)

    loss = jnp.float32(weight) * _regularization_loss(
        plane_x, plane_y, plane_z, rot_x, rot_y, rot_z, hasaxis)
    loss = loss + jnp.sum(sym_terms)
    return loss.reshape((1,))


# ---------------------------- pure-JAX reference ----------------------------
def _reference(points, near_point, planes, quats, weight, hasaxis):
    def reflect(p, pl4):
        n = pl4[:, None, :3]
        d = pl4[:, None, 3:4]
        nn = jnp.sum(n * n, axis=-1, keepdims=True) + 1e-12
        k = 2.0 * (jnp.sum(p * n, axis=-1, keepdims=True) + d) / nn
        return p - k * n

    def rotate(p, q):
        qn = q / (jnp.linalg.norm(q, axis=-1, keepdims=True) + 1e-12)
        w, x, y, z = qn[:, 0], qn[:, 1], qn[:, 2], qn[:, 3]
        R = jnp.stack([
            jnp.stack([1 - 2 * (y * y + z * z), 2 * (x * y - w * z), 2 * (x * z + w * y)], -1),
            jnp.stack([2 * (x * y + w * z), 1 - 2 * (x * x + z * z), 2 * (y * z - w * x)], -1),
            jnp.stack([2 * (x * z - w * y), 2 * (y * z + w * x), 1 - 2 * (x * x + y * y)], -1),
        ], -2)
        return jnp.einsum("bij,bnj->bni", R, p)

    def sym_loss(sp):
        return jnp.mean(jnp.sum((sp - near_point) ** 2, axis=-1))

    total = jnp.float32(weight) * _regularization_loss(
        planes[:, 0], planes[:, 1], planes[:, 2],
        quats[:, 0], quats[:, 1], quats[:, 2], hasaxis)
    for t in range(3):
        total = total + sym_loss(reflect(points, planes[:, t]))
    if hasaxis:
        for t in range(3):
            total = total + sym_loss(rotate(points, quats[:, t]))
    return total.reshape((1,))


if __name__ == "__main__":
    key = jax.random.PRNGKey(0)

    ok = True
    for (B, N, hasaxis) in [(2, 256, True), (3, 200, False)]:
        k1, k2, k3, k4, key = jax.random.split(key, 5)
        points = jax.random.normal(k1, (B, N, 3), dtype=jnp.float32)
        near_point = points + 0.01 * jax.random.normal(k2, (B, N, 3), dtype=jnp.float32)
        planes = jax.random.normal(k3, (B, 3, 4), dtype=jnp.float32)
        quats = jax.random.normal(k4, (B, 3, 4), dtype=jnp.float32)
        weight = 25.0

        out = all_loss(points, near_point,
                       planes[:, 0], planes[:, 1], planes[:, 2],
                       quats[:, 0], quats[:, 1], quats[:, 2],
                       weight=weight, hasaxis=hasaxis)
        out = jax.block_until_ready(out)

        ref = _reference(points, near_point, planes, quats, weight, hasaxis)
        assert out.shape == (1,) and out.dtype == jnp.float32
        if not jnp.allclose(out, ref, rtol=1e-3, atol=1e-3):
            ok = False
            print("MISMATCH", (B, N, hasaxis), out, ref)

    if ok:
        print("KERNEL_OK")
</pallas_src>

<mosaic_0001>
module attributes {stable_mosaic.version = 11 : i64} {
  func.func @_sym_loss_kernel(%arg0: i32, %arg1: memref<3x4x8x1xf32, #tpu.memory_space<vmem>>, %arg2: memref<3x4x8x1xf32, #tpu.memory_space<vmem>>, %arg3: memref<3x8x256xf32, #tpu.memory_space<vmem>>, %arg4: memref<3x8x256xf32, #tpu.memory_space<vmem>>, %arg5: memref<1x8x6xf32, #tpu.memory_space<vmem>>) attributes {dimension_semantics = [#tpu.dimension_semantics<parallel>], iteration_bounds = array<i64: 1>, scalar_prefetch = 0 : i64, scratch_operands = 0 : i64, tpu.core_type = #tpu.core_type<tc>, window_params = [{pipeline_mode = #tpu.pipeline_mode<synchronous>, transform_indices = @transform_0, window_bounds = array<i64: 3, 4, 8, 1>}, {pipeline_mode = #tpu.pipeline_mode<synchronous>, transform_indices = @transform_1, window_bounds = array<i64: 3, 4, 8, 1>}, {transform_indices = @transform_2, window_bounds = array<i64: 3, 8, 256>}, {transform_indices = @transform_3, window_bounds = array<i64: 3, 8, 256>}, {transform_indices = @transform_4, window_bounds = array<i64: 1, 8, 6>}]} {
    %c0 = arith.constant 0 : index
    %c0_0 = arith.constant 0 : index
    %c0_1 = arith.constant 0 : index
    %0 = vector.load %arg3[%c0, %c0_0, %c0_1] : memref<3x8x256xf32, #tpu.memory_space<vmem>>, vector<1x8x256xf32>
    %1 = vector.shape_cast %0 : vector<1x8x256xf32> to vector<8x256xf32>
    %c1 = arith.constant 1 : index
    %c0_2 = arith.constant 0 : index
    %c0_3 = arith.constant 0 : index
    %2 = vector.load %arg3[%c1, %c0_2, %c0_3] : memref<3x8x256xf32, #tpu.memory_space<vmem>>, vector<1x8x256xf32>
    %3 = vector.shape_cast %2 : vector<1x8x256xf32> to vector<8x256xf32>
    %c2 = arith.constant 2 : index
    %c0_4 = arith.constant 0 : index
    %c0_5 = arith.constant 0 : index
    %4 = vector.load %arg3[%c2, %c0_4, %c0_5] : memref<3x8x256xf32, #tpu.memory_space<vmem>>, vector<1x8x256xf32>
    %5 = vector.shape_cast %4 : vector<1x8x256xf32> to vector<8x256xf32>
    %c0_6 = arith.constant 0 : index
    %c0_7 = arith.constant 0 : index
    %c0_8 = arith.constant 0 : index
    %6 = vector.load %arg4[%c0_6, %c0_7, %c0_8] : memref<3x8x256xf32, #tpu.memory_space<vmem>>, vector<1x8x256xf32>
    %7 = vector.shape_cast %6 : vector<1x8x256xf32> to vector<8x256xf32>
    %c1_9 = arith.constant 1 : index
    %c0_10 = arith.constant 0 : index
    %c0_11 = arith.constant 0 : index
    %8 = vector.load %arg4[%c1_9, %c0_10, %c0_11] : memref<3x8x256xf32, #tpu.memory_space<vmem>>, vector<1x8x256xf32>
    %9 = vector.shape_cast %8 : vector<1x8x256xf32> to vector<8x256xf32>
    %c2_12 = arith.constant 2 : index
    %c0_13 = arith.constant 0 : index
    %c0_14 = arith.constant 0 : index
    %10 = vector.load %arg4[%c2_12, %c0_13, %c0_14] : memref<3x8x256xf32, #tpu.memory_space<vmem>>, vector<1x8x256xf32>
    %11 = vector.shape_cast %10 : vector<1x8x256xf32> to vector<8x256xf32>
    %c256_i32 = arith.constant 256 : i32
    %12 = arith.muli %arg0, %c256_i32 : i32
    %13 = tpu.iota {dimensions = array<i32: 1>} : vector<8x256xi32>
    %14 = vector.broadcast %12 : i32 to vector<8x256xi32>
    %15 = arith.addi %14, %13 : vector<8x256xi32>
    %16 = tpu.iota {dimensions = array<i32: 0>} : vector<8x256xi32>
    %c256_i32_15 = arith.constant 256 : i32
    %17 = vector.broadcast %c256_i32_15 : i32 to vector<8x256xi32>
    %18 = arith.cmpi slt, %15, %17 : vector<8x256xi32>
    %c2_i32 = arith.constant 2 : i32
    %19 = vector.broadcast %c2_i32 : i32 to vector<8x256xi32>
    %20 = arith.cmpi slt, %16, %19 : vector<8x256xi32>
    %21 = arith.andi %18, %20 : vector<8x256xi1>
    %22 = arith.extui %21 : vector<8x256xi1> to vector<8x256xi32>
    %23 = arith.sitofp %22 : vector<8x256xi32> to vector<8x256xf32>
    %c0_16 = arith.constant 0 : index
    %c0_17 = arith.constant 0 : index
    %c0_18 = arith.constant 0 : index
    %c0_19 = arith.constant 0 : index
    %24 = vector.load %arg1[%c0_16, %c0_17, %c0_18, %c0_19] : memref<3x4x8x1xf32, #tpu.memory_space<vmem>>, vector<1x1x8x1xf32>
    %25 = vector.shape_cast %24 : vector<1x1x8x1xf32> to vector<8x1xf32>
    %c0_20 = arith.constant 0 : index
    %c1_21 = arith.constant 1 : index
    %c0_22 = arith.constant 0 : index
    %c0_23 = arith.constant 0 : index
    %26 = vector.load %arg1[%c0_20, %c1_21, %c0_22, %c0_23] : memref<3x4x8x1xf32, #tpu.memory_space<vmem>>, vector<1x1x8x1xf32>
    %27 = vector.shape_cast %26 : vector<1x1x8x1xf32> to vector<8x1xf32>
    %c0_24 = arith.constant 0 : index
    %c2_25 = arith.constant 2 : index
    %c0_26 = arith.constant 0 : index
    %c0_27 = arith.constant 0 : index
    %28 = vector.load %arg1[%c0_24, %c2_25, %c0_26, %c0_27] : memref<3x4x8x1xf32, #tpu.memory_space<vmem>>, vector<1x1x8x1xf32>
    %29 = vector.shape_cast %28 : vector<1x1x8x1xf32> to vector<8x1xf32>
    %c0_28 = arith.constant 0 : index
    %c3 = arith.constant 3 : index
    %c0_29 = arith.constant 0 : index
    %c0_30 = arith.constant 0 : index
    %30 = vector.load %arg1[%c0_28, %c3, %c0_29, %c0_30] : memref<3x4x8x1xf32, #tpu.memory_space<vmem>>, vector<1x1x8x1xf32>
    %31 = vector.shape_cast %30 : vector<1x1x8x1xf32> to vector<8x1xf32>
    %32 = arith.mulf %25, %25 : vector<8x1xf32>
    %33 = arith.mulf %27, %27 : vector<8x1xf32>
    %34 = arith.addf %32, %33 : vector<8x1xf32>
    %35 = arith.mulf %29, %29 : vector<8x1xf32>
    %36 = arith.addf %34, %35 : vector<8x1xf32>
    %cst = arith.constant 9.99999996E-13 : f32
    %37 = vector.broadcast %cst : f32 to vector<8x1xf32>
    %38 = arith.addf %36, %37 : vector<8x1xf32>
    %cst_31 = arith.constant 2.000000e+00 : f32
    %39 = vector.broadcast %cst_31 : f32 to vector<8x1xf32>
    %40 = arith.divf %39, %38 : vector<8x1xf32>
    %41 = vector.broadcast %25 : vector<8x1xf32> to vector<8x256xf32>
    %42 = arith.mulf %41, %1 : vector<8x256xf32>
    %43 = vector.broadcast %27 : vector<8x1xf32> to vector<8x256xf32>
    %44 = arith.mulf %43, %3 : vector<8x256xf32>
    %45 = arith.addf %42, %44 : vector<8x256xf32>
    %46 = vector.broadcast %29 : vector<8x1xf32> to vector<8x256xf32>
    %47 = arith.mulf %46, %5 : vector<8x256xf32>
    %48 = arith.addf %45, %47 : vector<8x256xf32>
    %49 = vector.broadcast %31 : vector<8x1xf32> to vector<8x256xf32>
    %50 = arith.addf %48, %49 : vector<8x256xf32>
    %51 = vector.broadcast %40 : vector<8x1xf32> to vector<8x256xf32>
    %52 = arith.mulf %51, %50 : vector<8x256xf32>
    %53 = vector.broadcast %25 : vector<8x1xf32> to vector<8x256xf32>
    %54 = arith.mulf %52, %53 : vector<8x256xf32>
    %55 = arith.subf %1, %54 : vector<8x256xf32>
    %56 = arith.subf %55, %7 : vector<8x256xf32>
    %57 = vector.broadcast %27 : vector<8x1xf32> to vector<8x256xf32>
    %58 = arith.mulf %52, %57 : vector<8x256xf32>
    %59 = arith.subf %3, %58 : vector<8x256xf32>
    %60 = arith.subf %59, %9 : vector<8x256xf32>
    %61 = vector.broadcast %29 : vector<8x1xf32> to vector<8x256xf32>
    %62 = arith.mulf %52, %61 : vector<8x256xf32>
    %63 = arith.subf %5, %62 : vector<8x256xf32>
    %64 = arith.subf %63, %11 : vector<8x256xf32>
    %65 = arith.mulf %56, %56 : vector<8x256xf32>
    %66 = arith.mulf %60, %60 : vector<8x256xf32>
    %67 = arith.addf %65, %66 : vector<8x256xf32>
    %68 = arith.mulf %64, %64 : vector<8x256xf32>
    %69 = arith.addf %67, %68 : vector<8x256xf32>
    %70 = arith.mulf %69, %23 : vector<8x256xf32>
    %cst_32 = arith.constant dense<0.000000e+00> : vector<8xf32>
    %71 = vector.multi_reduction <add>, %70, %cst_32 [1] : vector<8x256xf32> to vector<8xf32>
    %72 = vector.shape_cast %71 : vector<8xf32> to vector<8x1xf32>
    %c1_33 = arith.constant 1 : index
    %c0_34 = arith.constant 0 : index
    %c0_35 = arith.constant 0 : index
    %c0_36 = arith.constant 0 : index
    %73 = vector.load %arg1[%c1_33, %c0_34, %c0_35, %c0_36] : memref<3x4x8x1xf32, #tpu.memory_space<vmem>>, vector<1x1x8x1xf32>
    %74 = vector.shape_cast %73 : vector<1x1x8x1xf32> to vector<8x1xf32>
    %c1_37 = arith.constant 1 : index
    %c1_38 = arith.constant 1 : index
    %c0_39 = arith.constant 0 : index
    %c0_40 = arith.constant 0 : index
    %75 = vector.load %arg1[%c1_37, %c1_38, %c0_39, %c0_40] : memref<3x4x8x1xf32, #tpu.memory_space<vmem>>, vector<1x1x8x1xf32>
    %76 = vector.shape_cast %75 : vector<1x1x8x1xf32> to vector<8x1xf32>
    %c1_41 = arith.constant 1 : index
    %c2_42 = arith.constant 2 : index
    %c0_43 = arith.constant 0 : index
    %c0_44 = arith.constant 0 : index
    %77 = vector.load %arg1[%c1_41, %c2_42, %c0_43, %c0_44] : memref<3x4x8x1xf32, #tpu.memory_space<vmem>>, vector<1x1x8x1xf32>
    %78 = vector.shape_cast %77 : vector<1x1x8x1xf32> to vector<8x1xf32>
    %c1_45 = arith.constant 1 : index
    %c3_46 = arith.constant 3 : index
    %c0_47 = arith.constant 0 : index
    %c0_48 = arith.constant 0 : index
    %79 = vector.load %arg1[%c1_45, %c3_46, %c0_47, %c0_48] : memref<3x4x8x1xf32, #tpu.memory_space<vmem>>, vector<1x1x8x1xf32>
    %80 = vector.shape_cast %79 : vector<1x1x8x1xf32> to vector<8x1xf32>
    %81 = arith.mulf %74, %74 : vector<8x1xf32>
    %82 = arith.mulf %76, %76 : vector<8x1xf32>
    %83 = arith.addf %81, %82 : vector<8x1xf32>
    %84 = arith.mulf %78, %78 : vector<8x1xf32>
    %85 = arith.addf %83, %84 : vector<8x1xf32>
    %cst_49 = arith.constant 9.99999996E-13 : f32
    %86 = vector.broadcast %cst_49 : f32 to vector<8x1xf32>
    %87 = arith.addf %85, %86 : vector<8x1xf32>
    %cst_50 = arith.constant 2.000000e+00 : f32
    %88 = vector.broadcast %cst_50 : f32 to vector<8x1xf32>
    %89 = arith.divf %88, %87 : vector<8x1xf32>
    %90 = vector.broadcast %74 : vector<8x1xf32> to vector<8x256xf32>
    %91 = arith.mulf %90, %1 : vector<8x256xf32>
    %92 = vector.broadcast %76 : vector<8x1xf32> to vector<8x256xf32>
    %93 = arith.mulf %92, %3 : vector<8x256xf32>
    %94 = arith.addf %91, %93 : vector<8x256xf32>
    %95 = vector.broadcast %78 : vector<8x1xf32> to vector<8x256xf32>
    %96 = arith.mulf %95, %5 : vector<8x256xf32>
    %97 = arith.addf %94, %96 : vector<8x256xf32>
    %98 = vector.broadcast %80 : vector<8x1xf32> to vector<8x256xf32>
    %99 = arith.addf %97, %98 : vector<8x256xf32>
    %100 = vector.broadcast %89 : vector<8x1xf32> to vector<8x256xf32>
    %101 = arith.mulf %100, %99 : vector<8x256xf32>
    %102 = vector.broadcast %74 : vector<8x1xf32> to vector<8x256xf32>
    %103 = arith.mulf %101, %102 : vector<8x256xf32>
    %104 = arith.subf %1, %103 : vector<8x256xf32>
    %105 = arith.subf %104, %7 : vector<8x256xf32>
    %106 = vector.broadcast %76 : vector<8x1xf32> to vector<8x256xf32>
    %107 = arith.mulf %101, %106 : vector<8x256xf32>
    %108 = arith.subf %3, %107 : vector<8x256xf32>
    %109 = arith.subf %108, %9 : vector<8x256xf32>
    %110 = vector.broadcast %78 : vector<8x1xf32> to vector<8x256xf32>
    %111 = arith.mulf %101, %110 : vector<8x256xf32>
    %112 = arith.subf %5, %111 : vector<8x256xf32>
    %113 = arith.subf %112, %11 : vector<8x256xf32>
    %114 = arith.mulf %105, %105 : vector<8x256xf32>
    %115 = arith.mulf %109, %109 : vector<8x256xf32>
    %116 = arith.addf %114, %115 : vector<8x256xf32>
    %117 = arith.mulf %113, %113 : vector<8x256xf32>
    %118 = arith.addf %116, %117 : vector<8x256xf32>
    %119 = arith.mulf %118, %23 : vector<8x256xf32>
    %cst_51 = arith.constant dense<0.000000e+00> : vector<8xf32>
    %120 = vector.multi_reduction <add>, %119, %cst_51 [1] : vector<8x256xf32> to vector<8xf32>
    %121 = vector.shape_cast %120 : vector<8xf32> to vector<8x1xf32>
    %c2_52 = arith.constant 2 : index
    %c0_53 = arith.constant 0 : index
    %c0_54 = arith.constant 0 : index
    %c0_55 = arith.constant 0 : index
    %122 = vector.load %arg1[%c2_52, %c0_53, %c0_54, %c0_55] : memref<3x4x8x1xf32, #tpu.memory_space<vmem>>, vector<1x1x8x1xf32>
    %123 = vector.shape_cast %122 : vector<1x1x8x1xf32> to vector<8x1xf32>
    %c2_56 = arith.constant 2 : index
    %c1_57 = arith.constant 1 : index
    %c0_58 = arith.constant 0 : index
    %c0_59 = arith.constant 0 : index
    %124 = vector.load %arg1[%c2_56, %c1_57, %c0_58, %c0_59] : memref<3x4x8x1xf32, #tpu.memory_space<vmem>>, vector<1x1x8x1xf32>
    %125 = vector.shape_cast %124 : vector<1x1x8x1xf32> to vector<8x1xf32>
    %c2_60 = arith.constant 2 : index
    %c2_61 = arith.constant 2 : index
    %c0_62 = arith.constant 0 : index
    %c0_63 = arith.constant 0 : index
    %126 = vector.load %arg1[%c2_60, %c2_61, %c0_62, %c0_63] : memref<3x4x8x1xf32, #tpu.memory_space<vmem>>, vector<1x1x8x1xf32>
    %127 = vector.shape_cast %126 : vector<1x1x8x1xf32> to vector<8x1xf32>
    %c2_64 = arith.constant 2 : index
    %c3_65 = arith.constant 3 : index
    %c0_66 = arith.constant 0 : index
    %c0_67 = arith.constant 0 : index
    %128 = vector.load %arg1[%c2_64, %c3_65, %c0_66, %c0_67] : memref<3x4x8x1xf32, #tpu.memory_space<vmem>>, vector<1x1x8x1xf32>
    %129 = vector.shape_cast %128 : vector<1x1x8x1xf32> to vector<8x1xf32>
    %130 = arith.mulf %123, %123 : vector<8x1xf32>
    %131 = arith.mulf %125, %125 : vector<8x1xf32>
    %132 = arith.addf %130, %131 : vector<8x1xf32>
    %133 = arith.mulf %127, %127 : vector<8x1xf32>
    %134 = arith.addf %132, %133 : vector<8x1xf32>
    %cst_68 = arith.constant 9.99999996E-13 : f32
    %135 = vector.broadcast %cst_68 : f32 to vector<8x1xf32>
    %136 = arith.addf %134, %135 : vector<8x1xf32>
    %cst_69 = arith.constant 2.000000e+00 : f32
    %137 = vector.broadcast %cst_69 : f32 to vector<8x1xf32>
    %138 = arith.divf %137, %136 : vector<8x1xf32>
    %139 = vector.broadcast %123 : vector<8x1xf32> to vector<8x256xf32>
    %140 = arith.mulf %139, %1 : vector<8x256xf32>
    %141 = vector.broadcast %125 : vector<8x1xf32> to vector<8x256xf32>
    %142 = arith.mulf %141, %3 : vector<8x256xf32>
    %143 = arith.addf %140, %142 : vector<8x256xf32>
    %144 = vector.broadcast %127 : vector<8x1xf32> to vector<8x256xf32>
    %145 = arith.mulf %144, %5 : vector<8x256xf32>
    %146 = arith.addf %143, %145 : vector<8x256xf32>
    %147 = vector.broadcast %129 : vector<8x1xf32> to vector<8x256xf32>
    %148 = arith.addf %146, %147 : vector<8x256xf32>
    %149 = vector.broadcast %138 : vector<8x1xf32> to vector<8x256xf32>
    %150 = arith.mulf %149, %148 : vector<8x256xf32>
    %151 = vector.broadcast %123 : vector<8x1xf32> to vector<8x256xf32>
    %152 = arith.mulf %150, %151 : vector<8x256xf32>
    %153 = arith.subf %1, %152 : vector<8x256xf32>
    %154 = arith.subf %153, %7 : vector<8x256xf32>
    %155 = vector.broadcast %125 : vector<8x1xf32> to vector<8x256xf32>
    %156 = arith.mulf %150, %155 : vector<8x256xf32>
    %157 = arith.subf %3, %156 : vector<8x256xf32>
    %158 = arith.subf %157, %9 : vector<8x256xf32>
    %159 = vector.broadcast %127 : vector<8x1xf32> to vector<8x256xf32>
    %160 = arith.mulf %150, %159 : vector<8x256xf32>
    %161 = arith.subf %5, %160 : vector<8x256xf32>
    %162 = arith.subf %161, %11 : vector<8x256xf32>
    %163 = arith.mulf %154, %154 : vector<8x256xf32>
    %164 = arith.mulf %158, %158 : vector<8x256xf32>
    %165 = arith.addf %163, %164 : vector<8x256xf32>
    %166 = arith.mulf %162, %162 : vector<8x256xf32>
    %167 = arith.addf %165, %166 : vector<8x256xf32>
    %168 = arith.mulf %167, %23 : vector<8x256xf32>
    %cst_70 = arith.constant dense<0.000000e+00> : vector<8xf32>
    %169 = vector.multi_reduction <add>, %168, %cst_70 [1] : vector<8x256xf32> to vector<8xf32>
    %170 = vector.shape_cast %169 : vector<8xf32> to vector<8x1xf32>
    %c0_71 = arith.constant 0 : index
    %c0_72 = arith.constant 0 : index
    %c0_73 = arith.constant 0 : index
    %c0_74 = arith.constant 0 : index
    %171 = vector.load %arg2[%c0_71, %c0_72, %c0_73, %c0_74] : memref<3x4x8x1xf32, #tpu.memory_space<vmem>>, vector<1x1x8x1xf32>
    %172 = vector.shape_cast %171 : vector<1x1x8x1xf32> to vector<8x1xf32>
    %c0_75 = arith.constant 0 : index
    %c1_76 = arith.constant 1 : index
    %c0_77 = arith.constant 0 : index
    %c0_78 = arith.constant 0 : index
    %173 = vector.load %arg2[%c0_75, %c1_76, %c0_77, %c0_78] : memref<3x4x8x1xf32, #tpu.memory_space<vmem>>, vector<1x1x8x1xf32>
    %174 = vector.shape_cast %173 : vector<1x1x8x1xf32> to vector<8x1xf32>
    %c0_79 = arith.constant 0 : index
    %c2_80 = arith.constant 2 : index
    %c0_81 = arith.constant 0 : index
    %c0_82 = arith.constant 0 : index
    %175 = vector.load %arg2[%c0_79, %c2_80, %c0_81, %c0_82] : memref<3x4x8x1xf32, #tpu.memory_space<vmem>>, vector<1x1x8x1xf32>
    %176 = vector.shape_cast %175 : vector<1x1x8x1xf32> to vector<8x1xf32>
    %c0_83 = arith.constant 0 : index
    %c3_84 = arith.constant 3 : index
    %c0_85 = arith.constant 0 : index
    %c0_86 = arith.constant 0 : index
    %177 = vector.load %arg2[%c0_83, %c3_84, %c0_85, %c0_86] : memref<3x4x8x1xf32, #tpu.memory_space<vmem>>, vector<1x1x8x1xf32>
    %178 = vector.shape_cast %177 : vector<1x1x8x1xf32> to vector<8x1xf32>
    %179 = arith.mulf %172, %172 : vector<8x1xf32>
    %180 = arith.mulf %174, %174 : vector<8x1xf32>
    %181 = arith.addf %179, %180 : vector<8x1xf32>
    %182 = arith.mulf %176, %176 : vector<8x1xf32>
    %183 = arith.addf %181, %182 : vector<8x1xf32>
    %184 = arith.mulf %178, %178 : vector<8x1xf32>
    %185 = arith.addf %183, %184 : vector<8x1xf32>
    %cst_87 = arith.constant 9.99999996E-13 : f32
    %186 = vector.broadcast %cst_87 : f32 to vector<8x1xf32>
    %187 = arith.addf %185, %186 : vector<8x1xf32>
    %188 = math.rsqrt %187 : vector<8x1xf32>
    %189 = arith.mulf %172, %188 : vector<8x1xf32>
    %190 = arith.mulf %174, %188 : vector<8x1xf32>
    %191 = arith.mulf %176, %188 : vector<8x1xf32>
    %192 = arith.mulf %178, %188 : vector<8x1xf32>
    %193 = arith.mulf %191, %191 : vector<8x1xf32>
    %194 = arith.mulf %192, %192 : vector<8x1xf32>
    %195 = arith.addf %193, %194 : vector<8x1xf32>
    %cst_88 = arith.constant 2.000000e+00 : f32
    %196 = vector.broadcast %cst_88 : f32 to vector<8x1xf32>
    %197 = arith.mulf %196, %195 : vector<8x1xf32>
    %cst_89 = arith.constant 1.000000e+00 : f32
    %198 = vector.broadcast %cst_89 : f32 to vector<8x1xf32>
    %199 = arith.subf %198, %197 : vector<8x1xf32>
    %200 = arith.mulf %190, %191 : vector<8x1xf32>
    %201 = arith.mulf %189, %192 : vector<8x1xf32>
    %202 = arith.subf %200, %201 : vector<8x1xf32>
    %cst_90 = arith.constant 2.000000e+00 : f32
    %203 = vector.broadcast %cst_90 : f32 to vector<8x1xf32>
    %204 = arith.mulf %203, %202 : vector<8x1xf32>
    %205 = arith.mulf %190, %192 : vector<8x1xf32>
    %206 = arith.mulf %189, %191 : vector<8x1xf32>
    %207 = arith.addf %205, %206 : vector<8x1xf32>
    %cst_91 = arith.constant 2.000000e+00 : f32
    %208 = vector.broadcast %cst_91 : f32 to vector<8x1xf32>
    %209 = arith.mulf %208, %207 : vector<8x1xf32>
    %210 = arith.mulf %190, %191 : vector<8x1xf32>
    %211 = arith.mulf %189, %192 : vector<8x1xf32>
    %212 = arith.addf %210, %211 : vector<8x1xf32>
    %cst_92 = arith.constant 2.000000e+00 : f32
    %213 = vector.broadcast %cst_92 : f32 to vector<8x1xf32>
    %214 = arith.mulf %213, %212 : vector<8x1xf32>
    %215 = arith.mulf %190, %190 : vector<8x1xf32>
    %216 = arith.mulf %192, %192 : vector<8x1xf32>
    %217 = arith.addf %215, %216 : vector<8x1xf32>
    %cst_93 = arith.constant 2.000000e+00 : f32
    %218 = vector.broadcast %cst_93 : f32 to vector<8x1xf32>
    %219 = arith.mulf %218, %217 : vector<8x1xf32>
    %cst_94 = arith.constant 1.000000e+00 : f32
    %220 = vector.broadcast %cst_94 : f32 to vector<8x1xf32>
    %221 = arith.subf %220, %219 : vector<8x1xf32>
    %222 = arith.mulf %191, %192 : vector<8x1xf32>
    %223 = arith.mulf %189, %190 : vector<8x1xf32>
    %224 = arith.subf %222, %223 : vector<8x1xf32>
    %cst_95 = arith.constant 2.000000e+00 : f32
    %225 = vector.broadcast %cst_95 : f32 to vector<8x1xf32>
    %226 = arith.mulf %225, %224 : vector<8x1xf32>
    %227 = arith.mulf %190, %192 : vector<8x1xf32>
    %228 = arith.mulf %189, %191 : vector<8x1xf32>
    %229 = arith.subf %227, %228 : vector<8x1xf32>
    %cst_96 = arith.constant 2.000000e+00 : f32
    %230 = vector.broadcast %cst_96 : f32 to vector<8x1xf32>
    %231 = arith.mulf %230, %229 : vector<8x1xf32>
    %232 = arith.mulf %191, %192 : vector<8x1xf32>
    %233 = arith.mulf %189, %190 : vector<8x1xf32>
    %234 = arith.addf %232, %233 : vector<8x1xf32>
    %cst_97 = arith.constant 2.000000e+00 : f32
    %235 = vector.broadcast %cst_97 : f32 to vector<8x1xf32>
    %236 = arith.mulf %235, %234 : vector<8x1xf32>
    %237 = arith.mulf %190, %190 : vector<8x1xf32>
    %238 = arith.mulf %191, %191 : vector<8x1xf32>
    %239 = arith.addf %237, %238 : vector<8x1xf32>
    %cst_98 = arith.constant 2.000000e+00 : f32
    %240 = vector.broadcast %cst_98 : f32 to vector<8x1xf32>
    %241 = arith.mulf %240, %239 : vector<8x1xf32>
    %cst_99 = arith.constant 1.000000e+00 : f32
    %242 = vector.broadcast %cst_99 : f32 to vector<8x1xf32>
    %243 = arith.subf %242, %241 : vector<8x1xf32>
    %244 = vector.broadcast %199 : vector<8x1xf32> to vector<8x256xf32>
    %245 = arith.mulf %244, %1 : vector<8x256xf32>
    %246 = vector.broadcast %204 : vector<8x1xf32> to vector<8x256xf32>
    %247 = arith.mulf %246, %3 : vector<8x256xf32>
    %248 = arith.addf %245, %247 : vector<8x256xf32>
    %249 = vector.broadcast %209 : vector<8x1xf32> to vector<8x256xf32>
    %250 = arith.mulf %249, %5 : vector<8x256xf32>
    %251 = arith.addf %248, %250 : vector<8x256xf32>
    %252 = arith.subf %251, %7 : vector<8x256xf32>
    %253 = vector.broadcast %214 : vector<8x1xf32> to vector<8x256xf32>
    %254 = arith.mulf %253, %1 : vector<8x256xf32>
    %255 = vector.broadcast %221 : vector<8x1xf32> to vector<8x256xf32>
    %256 = arith.mulf %255, %3 : vector<8x256xf32>
    %257 = arith.addf %254, %256 : vector<8x256xf32>
    %258 = vector.broadcast %226 : vector<8x1xf32> to vector<8x256xf32>
    %259 = arith.mulf %258, %5 : vector<8x256xf32>
    %260 = arith.addf %257, %259 : vector<8x256xf32>
    %261 = arith.subf %260, %9 : vector<8x256xf32>
    %262 = vector.broadcast %231 : vector<8x1xf32> to vector<8x256xf32>
    %263 = arith.mulf %262, %1 : vector<8x256xf32>
    %264 = vector.broadcast %236 : vector<8x1xf32> to vector<8x256xf32>
    %265 = arith.mulf %264, %3 : vector<8x256xf32>
    %266 = arith.addf %263, %265 : vector<8x256xf32>
    %267 = vector.broadcast %243 : vector<8x1xf32> to vector<8x256xf32>
    %268 = arith.mulf %267, %5 : vector<8x256xf32>
    %269 = arith.addf %266, %268 : vector<8x256xf32>
    %270 = arith.subf %269, %11 : vector<8x256xf32>
    %271 = arith.mulf %252, %252 : vector<8x256xf32>
    %272 = arith.mulf %261, %261 : vector<8x256xf32>
    %273 = arith.addf %271, %272 : vector<8x256xf32>
    %274 = arith.mulf %270, %270 : vector<8x256xf32>
    %275 = arith.addf %273, %274 : vector<8x256xf32>
    %276 = arith.mulf %275, %23 : vector<8x256xf32>
    %cst_100 = arith.constant dense<0.000000e+00> : vector<8xf32>
    %277 = vector.multi_reduction <add>, %276, %cst_100 [1] : vector<8x256xf32> to vector<8xf32>
    %278 = vector.shape_cast %277 : vector<8xf32> to vector<8x1xf32>
    %c1_101 = arith.constant 1 : index
    %c0_102 = arith.constant 0 : index
    %c0_103 = arith.constant 0 : index
    %c0_104 = arith.constant 0 : index
    %279 = vector.load %arg2[%c1_101, %c0_102, %c0_103, %c0_104] : memref<3x4x8x1xf32, #tpu.memory_space<vmem>>, vector<1x1x8x1xf32>
    %280 = vector.shape_cast %279 : vector<1x1x8x1xf32> to vector<8x1xf32>
    %c1_105 = arith.constant 1 : index
    %c1_106 = arith.constant 1 : index
    %c0_107 = arith.constant 0 : index
    %c0_108 = arith.constant 0 : index
    %281 = vector.load %arg2[%c1_105, %c1_106, %c0_107, %c0_108] : memref<3x4x8x1xf32, #tpu.memory_space<vmem>>, vector<1x1x8x1xf32>
    %282 = vector.shape_cast %281 : vector<1x1x8x1xf32> to vector<8x1xf32>
    %c1_109 = arith.constant 1 : index
    %c2_110 = arith.constant 2 : index
    %c0_111 = arith.constant 0 : index
    %c0_112 = arith.constant 0 : index
    %283 = vector.load %arg2[%c1_109, %c2_110, %c0_111, %c0_112] : memref<3x4x8x1xf32, #tpu.memory_space<vmem>>, vector<1x1x8x1xf32>
    %284 = vector.shape_cast %283 : vector<1x1x8x1xf32> to vector<8x1xf32>
    %c1_113 = arith.constant 1 : index
    %c3_114 = arith.constant 3 : index
    %c0_115 = arith.constant 0 : index
    %c0_116 = arith.constant 0 : index
    %285 = vector.load %arg2[%c1_113, %c3_114, %c0_115, %c0_116] : memref<3x4x8x1xf32, #tpu.memory_space<vmem>>, vector<1x1x8x1xf32>
    %286 = vector.shape_cast %285 : vector<1x1x8x1xf32> to vector<8x1xf32>
    %287 = arith.mulf %280, %280 : vector<8x1xf32>
    %288 = arith.mulf %282, %282 : vector<8x1xf32>
    %289 = arith.addf %287, %288 : vector<8x1xf32>
    %290 = arith.mulf %284, %284 : vector<8x1xf32>
    %291 = arith.addf %289, %290 : vector<8x1xf32>
    %292 = arith.mulf %286, %286 : vector<8x1xf32>
    %293 = arith.addf %291, %292 : vector<8x1xf32>
    %cst_117 = arith.constant 9.99999996E-13 : f32
    %294 = vector.broadcast %cst_117 : f32 to vector<8x1xf32>
    %295 = arith.addf %293, %294 : vector<8x1xf32>
    %296 = math.rsqrt %295 : vector<8x1xf32>
    %297 = arith.mulf %280, %296 : vector<8x1xf32>
    %298 = arith.mulf %282, %296 : vector<8x1xf32>
    %299 = arith.mulf %284, %296 : vector<8x1xf32>
    %300 = arith.mulf %286, %296 : vector<8x1xf32>
    %301 = arith.mulf %299, %299 : vector<8x1xf32>
    %302 = arith.mulf %300, %300 : vector<8x1xf32>
    %303 = arith.addf %301, %302 : vector<8x1xf32>
    %cst_118 = arith.constant 2.000000e+00 : f32
    %304 = vector.broadcast %cst_118 : f32 to vector<8x1xf32>
    %305 = arith.mulf %304, %303 : vector<8x1xf32>
    %cst_119 = arith.constant 1.000000e+00 : f32
    %306 = vector.broadcast %cst_119 : f32 to vector<8x1xf32>
    %307 = arith.subf %306, %305 : vector<8x1xf32>
    %308 = arith.mulf %298, %299 : vector<8x1xf32>
    %309 = arith.mulf %297, %300 : vector<8x1xf32>
    %310 = arith.subf %308, %309 : vector<8x1xf32>
    %cst_120 = arith.constant 2.000000e+00 : f32
    %311 = vector.broadcast %cst_120 : f32 to vector<8x1xf32>
    %312 = arith.mulf %311, %310 : vector<8x1xf32>
    %313 = arith.mulf %298, %300 : vector<8x1xf32>
    %314 = arith.mulf %297, %299 : vector<8x1xf32>
    %315 = arith.addf %313, %314 : vector<8x1xf32>
    %cst_121 = arith.constant 2.000000e+00 : f32
    %316 = vector.broadcast %cst_121 : f32 to vector<8x1xf32>
    %317 = arith.mulf %316, %315 : vector<8x1xf32>
    %318 = arith.mulf %298, %299 : vector<8x1xf32>
    %319 = arith.mulf %297, %300 : vector<8x1xf32>
    %320 = arith.addf %318, %319 : vector<8x1xf32>
    %cst_122 = arith.constant 2.000000e+00 : f32
    %321 = vector.broadcast %cst_122 : f32 to vector<8x1xf32>
    %322 = arith.mulf %321, %320 : vector<8x1xf32>
    %323 = arith.mulf %298, %298 : vector<8x1xf32>
    %324 = arith.mulf %300, %300 : vector<8x1xf32>
    %325 = arith.addf %323, %324 : vector<8x1xf32>
    %cst_123 = arith.constant 2.000000e+00 : f32
    %326 = vector.broadcast %cst_123 : f32 to vector<8x1xf32>
    %327 = arith.mulf %326, %325 : vector<8x1xf32>
    %cst_124 = arith.constant 1.000000e+00 : f32
    %328 = vector.broadcast %cst_124 : f32 to vector<8x1xf32>
    %329 = arith.subf %328, %327 : vector<8x1xf32>
    %330 = arith.mulf %299, %300 : vector<8x1xf32>
    %331 = arith.mulf %297, %298 : vector<8x1xf32>
    %332 = arith.subf %330, %331 : vector<8x1xf32>
    %cst_125 = arith.constant 2.000000e+00 : f32
    %333 = vector.broadcast %cst_125 : f32 to vector<8x1xf32>
    %334 = arith.mulf %333, %332 : vector<8x1xf32>
    %335 = arith.mulf %298, %300 : vector<8x1xf32>
    %336 = arith.mulf %297, %299 : vector<8x1xf32>
    %337 = arith.subf %335, %336 : vector<8x1xf32>
    %cst_126 = arith.constant 2.000000e+00 : f32
    %338 = vector.broadcast %cst_126 : f32 to vector<8x1xf32>
    %339 = arith.mulf %338, %337 : vector<8x1xf32>
    %340 = arith.mulf %299, %300 : vector<8x1xf32>
    %341 = arith.mulf %297, %298 : vector<8x1xf32>
    %342 = arith.addf %340, %341 : vector<8x1xf32>
    %cst_127 = arith.constant 2.000000e+00 : f32
    %343 = vector.broadcast %cst_127 : f32 to vector<8x1xf32>
    %344 = arith.mulf %343, %342 : vector<8x1xf32>
    %345 = arith.mulf %298, %298 : vector<8x1xf32>
    %346 = arith.mulf %299, %299 : vector<8x1xf32>
    %347 = arith.addf %345, %346 : vector<8x1xf32>
    %cst_128 = arith.constant 2.000000e+00 : f32
    %348 = vector.broadcast %cst_128 : f32 to vector<8x1xf32>
    %349 = arith.mulf %348, %347 : vector<8x1xf32>
    %cst_129 = arith.constant 1.000000e+00 : f32
    %350 = vector.broadcast %cst_129 : f32 to vector<8x1xf32>
    %351 = arith.subf %350, %349 : vector<8x1xf32>
    %352 = vector.broadcast %307 : vector<8x1xf32> to vector<8x256xf32>
    %353 = arith.mulf %352, %1 : vector<8x256xf32>
    %354 = vector.broadcast %312 : vector<8x1xf32> to vector<8x256xf32>
    %355 = arith.mulf %354, %3 : vector<8x256xf32>
    %356 = arith.addf %353, %355 : vector<8x256xf32>
    %357 = vector.broadcast %317 : vector<8x1xf32> to vector<8x256xf32>
    %358 = arith.mulf %357, %5 : vector<8x256xf32>
    %359 = arith.addf %356, %358 : vector<8x256xf32>
    %360 = arith.subf %359, %7 : vector<8x256xf32>
    %361 = vector.broadcast %322 : vector<8x1xf32> to vector<8x256xf32>
    %362 = arith.mulf %361, %1 : vector<8x256xf32>
    %363 = vector.broadcast %329 : vector<8x1xf32> to vector<8x256xf32>
    %364 = arith.mulf %363, %3 : vector<8x256xf32>
    %365 = arith.addf %362, %364 : vector<8x256xf32>
    %366 = vector.broadcast %334 : vector<8x1xf32> to vector<8x256xf32>
    %367 = arith.mulf %366, %5 : vector<8x256xf32>
    %368 = arith.addf %365, %367 : vector<8x256xf32>
    %369 = arith.subf %368, %9 : vector<8x256xf32>
    %370 = vector.broadcast %339 : vector<8x1xf32> to vector<8x256xf32>
    %371 = arith.mulf %370, %1 : vector<8x256xf32>
    %372 = vector.broadcast %344 : vector<8x1xf32> to vector<8x256xf32>
    %373 = arith.mulf %372, %3 : vector<8x256xf32>
    %374 = arith.addf %371, %373 : vector<8x256xf32>
    %375 = vector.broadcast %351 : vector<8x1xf32> to vector<8x256xf32>
    %376 = arith.mulf %375, %5 : vector<8x256xf32>
    %377 = arith.addf %374, %376 : vector<8x256xf32>
    %378 = arith.subf %377, %11 : vector<8x256xf32>
    %379 = arith.mulf %360, %360 : vector<8x256xf32>
    %380 = arith.mulf %369, %369 : vector<8x256xf32>
    %381 = arith.addf %379, %380 : vector<8x256xf32>
    %382 = arith.mulf %378, %378 : vector<8x256xf32>
    %383 = arith.addf %381, %382 : vector<8x256xf32>
    %384 = arith.mulf %383, %23 : vector<8x256xf32>
    %cst_130 = arith.constant dense<0.000000e+00> : vector<8xf32>
    %385 = vector.multi_reduction <add>, %384, %cst_130 [1] : vector<8x256xf32> to vector<8xf32>
    %386 = vector.shape_cast %385 : vector<8xf32> to vector<8x1xf32>
    %c2_131 = arith.constant 2 : index
    %c0_132 = arith.constant 0 : index
    %c0_133 = arith.constant 0 : index
    %c0_134 = arith.constant 0 : index
    %387 = vector.load %arg2[%c2_131, %c0_132, %c0_133, %c0_134] : memref<3x4x8x1xf32, #tpu.memory_space<vmem>>, vector<1x1x8x1xf32>
    %388 = vector.shape_cast %387 : vector<1x1x8x1xf32> to vector<8x1xf32>
    %c2_135 = arith.constant 2 : index
    %c1_136 = arith.constant 1 : index
    %c0_137 = arith.constant 0 : index
    %c0_138 = arith.constant 0 : index
    %389 = vector.load %arg2[%c2_135, %c1_136, %c0_137, %c0_138] : memref<3x4x8x1xf32, #tpu.memory_space<vmem>>, vector<1x1x8x1xf32>
    %390 = vector.shape_cast %389 : vector<1x1x8x1xf32> to vector<8x1xf32>
    %c2_139 = arith.constant 2 : index
    %c2_140 = arith.constant 2 : index
    %c0_141 = arith.constant 0 : index
    %c0_142 = arith.constant 0 : index
    %391 = vector.load %arg2[%c2_139, %c2_140, %c0_141, %c0_142] : memref<3x4x8x1xf32, #tpu.memory_space<vmem>>, vector<1x1x8x1xf32>
    %392 = vector.shape_cast %391 : vector<1x1x8x1xf32> to vector<8x1xf32>
    %c2_143 = arith.constant 2 : index
    %c3_144 = arith.constant 3 : index
    %c0_145 = arith.constant 0 : index
    %c0_146 = arith.constant 0 : index
    %393 = vector.load %arg2[%c2_143, %c3_144, %c0_145, %c0_146] : memref<3x4x8x1xf32, #tpu.memory_space<vmem>>, vector<1x1x8x1xf32>
    %394 = vector.shape_cast %393 : vector<1x1x8x1xf32> to vector<8x1xf32>
    %395 = arith.mulf %388, %388 : vector<8x1xf32>
    %396 = arith.mulf %390, %390 : vector<8x1xf32>
    %397 = arith.addf %395, %396 : vector<8x1xf32>
    %398 = arith.mulf %392, %392 : vector<8x1xf32>
    %399 = arith.addf %397, %398 : vector<8x1xf32>
    %400 = arith.mulf %394, %394 : vector<8x1xf32>
    %401 = arith.addf %399, %400 : vector<8x1xf32>
    %cst_147 = arith.constant 9.99999996E-13 : f32
    %402 = vector.broadcast %cst_147 : f32 to vector<8x1xf32>
    %403 = arith.addf %401, %402 : vector<8x1xf32>
    %404 = math.rsqrt %403 : vector<8x1xf32>
    %405 = arith.mulf %388, %404 : vector<8x1xf32>
    %406 = arith.mulf %390, %404 : vector<8x1xf32>
    %407 = arith.mulf %392, %404 : vector<8x1xf32>
    %408 = arith.mulf %394, %404 : vector<8x1xf32>
    %409 = arith.mulf %407, %407 : vector<8x1xf32>
    %410 = arith.mulf %408, %408 : vector<8x1xf32>
    %411 = arith.addf %409, %410 : vector<8x1xf32>
    %cst_148 = arith.constant 2.000000e+00 : f32
    %412 = vector.broadcast %cst_148 : f32 to vector<8x1xf32>
    %413 = arith.mulf %412, %411 : vector<8x1xf32>
    %cst_149 = arith.constant 1.000000e+00 : f32
    %414 = vector.broadcast %cst_149 : f32 to vector<8x1xf32>
    %415 = arith.subf %414, %413 : vector<8x1xf32>
    %416 = arith.mulf %406, %407 : vector<8x1xf32>
    %417 = arith.mulf %405, %408 : vector<8x1xf32>
    %418 = arith.subf %416, %417 : vector<8x1xf32>
    %cst_150 = arith.constant 2.000000e+00 : f32
    %419 = vector.broadcast %cst_150 : f32 to vector<8x1xf32>
    %420 = arith.mulf %419, %418 : vector<8x1xf32>
    %421 = arith.mulf %406, %408 : vector<8x1xf32>
    %422 = arith.mulf %405, %407 : vector<8x1xf32>
    %423 = arith.addf %421, %422 : vector<8x1xf32>
    %cst_151 = arith.constant 2.000000e+00 : f32
    %424 = vector.broadcast %cst_151 : f32 to vector<8x1xf32>
    %425 = arith.mulf %424, %423 : vector<8x1xf32>
    %426 = arith.mulf %406, %407 : vector<8x1xf32>
    %427 = arith.mulf %405, %408 : vector<8x1xf32>
    %428 = arith.addf %426, %427 : vector<8x1xf32>
    %cst_152 = arith.constant 2.000000e+00 : f32
    %429 = vector.broadcast %cst_152 : f32 to vector<8x1xf32>
    %430 = arith.mulf %429, %428 : vector<8x1xf32>
    %431 = arith.mulf %406, %406 : vector<8x1xf32>
    %432 = arith.mulf %408, %408 : vector<8x1xf32>
    %433 = arith.addf %431, %432 : vector<8x1xf32>
    %cst_153 = arith.constant 2.000000e+00 : f32
    %434 = vector.broadcast %cst_153 : f32 to vector<8x1xf32>
    %435 = arith.mulf %434, %433 : vector<8x1xf32>
    %cst_154 = arith.constant 1.000000e+00 : f32
    %436 = vector.broadcast %cst_154 : f32 to vector<8x1xf32>
    %437 = arith.subf %436, %435 : vector<8x1xf32>
    %438 = arith.mulf %407, %408 : vector<8x1xf32>
    %439 = arith.mulf %405, %406 : vector<8x1xf32>
    %440 = arith.subf %438, %439 : vector<8x1xf32>
    %cst_155 = arith.constant 2.000000e+00 : f32
    %441 = vector.broadcast %cst_155 : f32 to vector<8x1xf32>
    %442 = arith.mulf %441, %440 : vector<8x1xf32>
    %443 = arith.mulf %406, %408 : vector<8x1xf32>
    %444 = arith.mulf %405, %407 : vector<8x1xf32>
    %445 = arith.subf %443, %444 : vector<8x1xf32>
    %cst_156 = arith.constant 2.000000e+00 : f32
    %446 = vector.broadcast %cst_156 : f32 to vector<8x1xf32>
    %447 = arith.mulf %446, %445 : vector<8x1xf32>
    %448 = arith.mulf %407, %408 : vector<8x1xf32>
    %449 = arith.mulf %405, %406 : vector<8x1xf32>
    %450 = arith.addf %448, %449 : vector<8x1xf32>
    %cst_157 = arith.constant 2.000000e+00 : f32
    %451 = vector.broadcast %cst_157 : f32 to vector<8x1xf32>
    %452 = arith.mulf %451, %450 : vector<8x1xf32>
    %453 = arith.mulf %406, %406 : vector<8x1xf32>
    %454 = arith.mulf %407, %407 : vector<8x1xf32>
    %455 = arith.addf %453, %454 : vector<8x1xf32>
    %cst_158 = arith.constant 2.000000e+00 : f32
    %456 = vector.broadcast %cst_158 : f32 to vector<8x1xf32>
    %457 = arith.mulf %456, %455 : vector<8x1xf32>
    %cst_159 = arith.constant 1.000000e+00 : f32
    %458 = vector.broadcast %cst_159 : f32 to vector<8x1xf32>
    %459 = arith.subf %458, %457 : vector<8x1xf32>
    %460 = vector.broadcast %415 : vector<8x1xf32> to vector<8x256xf32>
    %461 = arith.mulf %460, %1 : vector<8x256xf32>
    %462 = vector.broadcast %420 : vector<8x1xf32> to vector<8x256xf32>
    %463 = arith.mulf %462, %3 : vector<8x256xf32>
    %464 = arith.addf %461, %463 : vector<8x256xf32>
    %465 = vector.broadcast %425 : vector<8x1xf32> to vector<8x256xf32>
    %466 = arith.mulf %465, %5 : vector<8x256xf32>
    %467 = arith.addf %464, %466 : vector<8x256xf32>
    %468 = arith.subf %467, %7 : vector<8x256xf32>
    %469 = vector.broadcast %430 : vector<8x1xf32> to vector<8x256xf32>
    %470 = arith.mulf %469, %1 : vector<8x256xf32>
    %471 = vector.broadcast %437 : vector<8x1xf32> to vector<8x256xf32>
    %472 = arith.mulf %471, %3 : vector<8x256xf32>
    %473 = arith.addf %470, %472 : vector<8x256xf32>
    %474 = vector.broadcast %442 : vector<8x1xf32> to vector<8x256xf32>
    %475 = arith.mulf %474, %5 : vector<8x256xf32>
    %476 = arith.addf %473, %475 : vector<8x256xf32>
    %477 = arith.subf %476, %9 : vector<8x256xf32>
    %478 = vector.broadcast %447 : vector<8x1xf32> to vector<8x256xf32>
    %479 = arith.mulf %478, %1 : vector<8x256xf32>
    %480 = vector.broadcast %452 : vector<8x1xf32> to vector<8x256xf32>
    %481 = arith.mulf %480, %3 : vector<8x256xf32>
    %482 = arith.addf %479, %481 : vector<8x256xf32>
    %483 = vector.broadcast %459 : vector<8x1xf32> to vector<8x256xf32>
    %484 = arith.mulf %483, %5 : vector<8x256xf32>
    %485 = arith.addf %482, %484 : vector<8x256xf32>
    %486 = arith.subf %485, %11 : vector<8x256xf32>
    %487 = arith.mulf %468, %468 : vector<8x256xf32>
    %488 = arith.mulf %477, %477 : vector<8x256xf32>
    %489 = arith.addf %487, %488 : vector<8x256xf32>
    %490 = arith.mulf %486, %486 : vector<8x256xf32>
    %491 = arith.addf %489, %490 : vector<8x256xf32>
    %492 = arith.mulf %491, %23 : vector<8x256xf32>
    %cst_160 = arith.constant dense<0.000000e+00> : vector<8xf32>
    %493 = vector.multi_reduction <add>, %492, %cst_160 [1] : vector<8x256xf32> to vector<8xf32>
    %494 = vector.shape_cast %493 : vector<8xf32> to vector<8x1xf32>
    %495 = tpu.concatenate %72, %121, %170, %278, %386, %494 in 1 : vector<8x1xf32>, vector<8x1xf32>, vector<8x1xf32>, vector<8x1xf32>, vector<8x1xf32>, vector<8x1xf32> -> vector<8x6xf32>
    %c0_161 = arith.constant 0 : index
    %c0_162 = arith.constant 0 : index
    %c0_163 = arith.constant 0 : index
    %496 = vector.load %arg5[%c0_161, %c0_162, %c0_163] : memref<1x8x6xf32, #tpu.memory_space<vmem>>, vector<1x8x6xf32>
    %497 = vector.shape_cast %496 : vector<1x8x6xf32> to vector<8x6xf32>
    %498 = vector.shape_cast %495 : vector<8x6xf32> to vector<1x8x6xf32>
    tpu.vector_store %arg5[%c0_161, %c0_162, %c0_163], %498 {strides = array<i32>} : memref<1x8x6xf32, #tpu.memory_space<vmem>>, vector<1x8x6xf32>,
    return
  }
  func.func @transform_0(%arg0: i32) -> (i32, i32, i32, i32) {
    %c0_i32 = arith.constant 0 : i32
    %c0_i32_0 = arith.constant 0 : i32
    %c0_i32_1 = arith.constant 0 : i32
    %c0_i32_2 = arith.constant 0 : i32
    %c0_i32_3 = arith.constant 0 : i32
    return %c0_i32, %c0_i32_0, %c0_i32_1, %c0_i32_2 : i32, i32, i32, i32
  }
  func.func @transform_1(%arg0: i32) -> (i32, i32, i32, i32) {
    %c0_i32 = arith.constant 0 : i32
    %c0_i32_0 = arith.constant 0 : i32
    %c0_i32_1 = arith.constant 0 : i32
    %c0_i32_2 = arith.constant 0 : i32
    %c0_i32_3 = arith.constant 0 : i32
    return %c0_i32, %c0_i32_0, %c0_i32_1, %c0_i32_2 : i32, i32, i32, i32
  }
  func.func @transform_2(%arg0: i32) -> (i32, i32, i32) {
    %c0_i32 = arith.constant 0 : i32
    %c0_i32_0 = arith.constant 0 : i32
    %c0_i32_1 = arith.constant 0 : i32
    return %c0_i32, %c0_i32_0, %arg0 : i32, i32, i32
  }
  func.func @transform_3(%arg0: i32) -> (i32, i32, i32) {
    %c0_i32 = arith.constant 0 : i32
    %c0_i32_0 = arith.constant 0 : i32
    %c0_i32_1 = arith.constant 0 : i32
    return %c0_i32, %c0_i32_0, %arg0 : i32, i32, i32
  }
  func.func @transform_4(%arg0: i32) -> (i32, i32, i32) {
    %c0_i32 = arith.constant 0 : i32
    %c0_i32_0 = arith.constant 0 : i32
    %c0_i32_1 = arith.constant 0 : i32
    return %arg0, %c0_i32, %c0_i32_0 : i32, i32, i32
  }
}

</mosaic_0001>

<bundles_post_ra>
// kernel: all_loss.1
= control target key start
LH: loop header
LB: loop body
LE: loop exit
PB: predicated region body
PF: predicated region fallthrough
CT: control target
= control target key end

     0   :  { %v818_v0 = vmov 0   ;;  %vm754_vm1 = vcmask 7168   ;;  %vm756_vm2 = vcmask 15360   ;;  %vm758_vm3 = vcmask 23552   ;;  %s1302_s0 = inlined_call_operand.vmem [shape: f32[3,4,8,1], index: 0, kind: input, shape index: {}]   ;;  %s1303_s1 = inlined_call_operand.vmem [shape: f32[3,4,8,1], index: 1, kind: input, shape index: {}]   ;;  %s1304_s2 = inlined_call_operand.vmem [shape: f32[3,8,256], index: 2, kind: input, shape index: {}]   ;;  %s1305_s3 = inlined_call_operand.vmem [shape: f32[3,8,256], index: 3, kind: input, shape index: {}]   ;;  %s1306_s4 = inlined_call_operand.vmem [shape: f32[1,8,6], index: 4, kind: output, shape index: {}]  }
   0x1   :  { %804 = vset.pattern.permute.xlu0 %v818_v0  ;;  %v51_v1 = vld [vmem:[%s1302_s0] sm:$0xff]  ;;  %805 = vset.pattern.permute.xlu1 %v818_v0  ;;  %v780_v2 = vld [vmem:[%s1302_s0 + $0x8] sm:$0xff]  ;;  %v781_v3 = vld [vmem:[%s1302_s0 + $0x10] sm:$0xff]  ;;  %vm760_vm4 = vcmask 31744   ;;  %vm762_vm5 = vcmask 39936   ;;  %vm764_vm6 = vcmask 48128  }
   0x2   :  { %68 = vperm.xlu0 %804, %v51_v1   ;;  %v58_v4 = vmul.f32 %v51_v1, %v51_v1  ;;  %v59_v5 = vmul.f32 %v780_v2, %v780_v2  ;;  %84 = vperm.xlu1 %805, %v781_v3   ;;  %v61_v6 = vmul.f32 %v781_v3, %v781_v3  ;;  %v783_v7 = vld [vmem:[%s1302_s0 + $0x20] sm:$0xff]  ;;  %v782_v8 = vld [vmem:[%s1302_s0 + $0x18] sm:$0xff]  ;;  %v784_v9 = vld [vmem:[%s1302_s0 + $0x28] sm:$0xff] }
   0x3   :  { %v146_v10 = vmul.f32 %v783_v7, %v783_v7  ;;  %v147_v11 = vmul.f32 %v784_v9, %v784_v9  ;;  %v787_v12 = vld [vmem:[%s1302_s0 + $0x40] sm:$0xff]  ;;  %v785_v13 = vld [vmem:[%s1302_s0 + $0x30] sm:$0xff]  ;;  %v788_v14 = vld [vmem:[%s1302_s0 + $0x48] sm:$0xff] }
   0x4   :  { %v60_v15 = vadd.f32 %v59_v5, %v58_v4  ;;  %v234_v16 = vmul.f32 %v787_v12, %v787_v12  ;;  %v149_v17 = vmul.f32 %v785_v13, %v785_v13  ;;  %v875_v18 = vld [vmem:[%s1302_s0 + $0x50] sm:$0xff]  ;;  %v235_v19 = vmul.f32 %v788_v14, %v788_v14  ;;  %v882_v22 = vld [vmem:[%s1303_s1] sm:$0xff]  ;;  %v887_v23 = vld [vmem:[%s1303_s1 + $0x8] sm:$0xff] }
   0x5   :  { %v148_v20 = vadd.f32 %v147_v11, %v146_v10  ;;  %v237_v21 = vmul.f32 %v875_v18, %v875_v18  ;;  %v892_v24 = vld [vmem:[%s1303_s1 + $0x10] sm:$0xff]  ;;  %v897_v27 = vld [vmem:[%s1303_s1 + $0x18] sm:$0xff]  ;;  %v321_v28 = vmul.f32 %v882_v22, %v882_v22  ;;  %v904_v29 = vld [vmem:[%s1303_s1 + $0x20] sm:$0xff]  ;;  %v322_v32 = vmul.f32 %v887_v23, %v887_v23 }
   0x6   :  { %75 = vperm.xlu0 %804, %v780_v2   ;;  %v62_v25 = vadd.f32 %v61_v6, %v60_v15  ;;  %93 = vperm.xlu1 %805, %v782_v8   ;;  %v236_v26 = vadd.f32 %v235_v19, %v234_v16  ;;  %v909_v30 = vld [vmem:[%s1303_s1 + $0x28] sm:$0xff]  ;;  %v324_v33 = vmul.f32 %v892_v24, %v892_v24  ;;  %v920_v35 = vld [vmem:[%s1303_s1 + $0x30] sm:$0xff]  ;;  %v797_v36 = vld [vmem:[%s1303_s1 + $0x38] sm:$0xff] }
   0x7   :  { %v150_v31 = vadd.f32 %v149_v17, %v148_v20  ;;  %v326_v34 = vmul.f32 %v897_v27, %v897_v27  ;;  %v928_v37 = vld [vmem:[%s1303_s1 + $0x40] sm:$0xff]  ;;  %v468_v40 = vmul.f32 %v904_v29, %v904_v29  ;;  %v469_v41 = vmul.f32 %v909_v30, %v909_v30  ;;  %v937_v42 = vld [vmem:[%s1303_s1 + $0x48] sm:$0xff]  ;;  %v942_v43 = vld [vmem:[%s1303_s1 + $0x50] sm:$0xff] }
   0x8   :  { %v63_v38 = vadd.f32 1e-12, %v62_v25  ;;  %v238_v39 = vadd.f32 %v237_v21, %v236_v26  ;;  %v323_v45 = vadd.f32 %v322_v32, %v321_v28  ;;  %v471_v46 = vmul.f32 %v920_v35, %v920_v35  ;;  %v801_v50 = vld [vmem:[%s1303_s1 + $0x58] sm:$0xff] }
   0x9   :  { %v151_v44 = vadd.f32 1e-12, %v150_v31  ;;  %v473_v47 = vmul.f32 %v797_v36, %v797_v36  ;;  %v470_v49 = vadd.f32 %v469_v41, %v468_v40  ;;  %v615_v51 = vmul.f32 %v928_v37, %v928_v37  ;;  %v790_v60 = vld [vmem:[%s1302_s0 + $0x58] sm:$0xff] }
   0xa   :  { %806 = vrcp.f32 %v63_v38  ;;  %156 = vperm.xlu0 %804, %v783_v7   ;;  %244 = vperm.xlu1 %805, %v787_v12   ;;  %v239_v48 = vadd.f32 1e-12, %v238_v39  ;;  %v325_v52 = vadd.f32 %v324_v33, %v323_v45  ;;  %v616_v53 = vmul.f32 %v937_v42, %v937_v42  ;;  %v786_v7 = vld [vmem:[%s1302_s0 + $0x38] sm:$0xff] }
   0xb   :  { %v618_v54 = vmul.f32 %v942_v43, %v942_v43  ;;  %v472_v55 = vadd.f32 %v471_v46, %v470_v49  ;;  %v620_v58 = vmul.f32 %v801_v50, %v801_v50 }
   0xc   :  { %808 = vrcp.f32 %v239_v48  ;;  %v327_v56 = vadd.f32 %v326_v34, %v325_v52  ;;  %v617_v57 = vadd.f32 %v616_v53, %v615_v51 }
   0xd   :  { %810 = vrcp.f32 %v151_v44  ;;  %v474_v59 = vadd.f32 %v473_v47, %v472_v55 }
   0xe   :  { %163 = vperm.xlu0 %804, %v784_v9   ;;  %251 = vperm.xlu1 %805, %v788_v14   ;;  %v328_v61 = vadd.f32 1e-12, %v327_v56  ;;  %v619_v62 = vadd.f32 %v618_v54, %v617_v57 }
   0xf   :  { %v475_v63 = vadd.f32 1e-12, %v474_v59 }
  0x10   :  { %812 = vrsqrt.f32 %v328_v61  ;;  %v621_v0 = vadd.f32 %v620_v58, %v619_v62 }
  0x11   :  { %814 = vrsqrt.f32 %v475_v63 }
  0x12   :  { %172 = vperm.xlu0 %804, %v785_v13   ;;  %269 = vperm.xlu1 %805, %v790_v60   ;;  %v622_v1 = vadd.f32 1e-12, %v621_v0 }
  0x14   :  { %v807_v2 = vpop.eup %806  ;;  %816 = vrsqrt.f32 %v622_v1 }
  0x15   :  { %v65_v3 = vmul.f32 2.0, %v807_v2 }
  0x16   :  { %v809_v4 = vpop.eup %808 }
  0x17   :  { %100 = vperm.xlu0 %804, %v65_v3   ;;  %v241_v5 = vmul.f32 2.0, %v809_v4  ;;  %v811_v6 = vpop.eup %810 }
  0x18   :  { %v153_v9 = vmul.f32 2.0, %v811_v6 }
  0x19   :  { %276 = vperm.xlu1 %805, %v241_v5  }
  0x1a   :  { %v813_v8 = vpop.eup %812 }
  0x1b   :  { %181 = vperm.xlu0 %804, %v786_v7   ;;  %v815_v10 = vpop.eup %814  ;;  %v330_v11 = vmul.f32 %v813_v8, %v882_v22  ;;  %v331_v12 = vmul.f32 %v813_v8, %v887_v23  ;;  %v332_v13 = vmul.f32 %v813_v8, %v892_v24  ;;  %v333_v14 = vmul.f32 %v813_v8, %v897_v27 }
  0x1c   :  { %v966_v15 = vmul.f32 %v815_v10, %v909_v30  ;;  %v968_v16 = vmul.f32 %v815_v10, %v797_v36  ;;  %v1016_v44 = vmul.f32 %v815_v10, %v904_v29  ;;  %v1019_v45 = vmul.f32 %v815_v10, %v920_v35 }
  0x1d   :  { %v970_v17 = vmul.f32 %v333_v14, %v332_v13  ;;  %v972_v19 = vmul.f32 %v331_v12, %v330_v11  ;;  %v974_v20 = vmul.f32 %v332_v13, %v332_v13  ;;  %v335_v21 = vmul.f32 %v333_v14, %v333_v14 }
  0x1e   :  { %v817_v25 = vpop.eup %816  ;;  %v978_v22 = vmul.f32 %v968_v16, %v968_v16  ;;  %v982_v23 = vmul.f32 %v966_v15, %v966_v15  ;;  %v339_v24 = vmul.f32 %v332_v13, %v331_v12  ;;  %v340_v26 = vmul.f32 %v333_v14, %v330_v11 }
  0x1f   :  { %188 = vperm.xlu0 %804, %v153_v9   ;;  %v359_v27 = vadd.f32 %v972_v19, %v970_v17  ;;  %v987_v28 = vmul.f32 %v817_v25, %v928_v37  ;;  %v990_v30 = vmul.f32 %v817_v25, %v937_v42  ;;  %v993_v31 = vmul.f32 %v817_v25, %v942_v43 }
  0x20   :  { %v497_v32 = vadd.f32 %v982_v23, %v978_v22  ;;  %v997_v33 = vmul.f32 %v817_v25, %v801_v50  ;;  %v336_v34 = vadd.f32 %v335_v21, %v974_v20  ;;  %v341_v39 = vsub.f32 %v339_v24, %v340_v26 }
  0x21   :  { %v360_v36 = vmul.f32 2.0, %v359_v27  ;;  %v1002_v38 = vmul.f32 %v993_v31, %v990_v30  ;;  %v643_v37 = vmul.f32 %v990_v30, %v990_v30  ;;  %v343_v46 = vmul.f32 %v333_v14, %v331_v12 }
  0x22   :  { %v498_v40 = vmul.f32 2.0, %v497_v32  ;;  %v1009_v41 = vmul.f32 %v997_v33, %v987_v28  ;;  %v337_v42 = vmul.f32 2.0, %v336_v34  ;;  %v1013_v43 = vmul.f32 %v997_v33, %v997_v33 }
  0x23   :  { %260 = vperm.xlu0 %804, %v875_v18   ;;  %427 = vperm.xlu1 %805, %v360_v36   ;;  %v344_v47 = vmul.f32 %v332_v13, %v330_v11  ;;  %v342_v51 = vmul.f32 2.0, %v341_v39  ;;  %v500_v29 = vmul.f32 %v968_v16, %v1019_v45  ;;  %v501_v35 = vmul.f32 %v966_v15, %v1016_v44 }
  0x24   :  { %v499_v48 = vsub.f32 1.0, %v498_v40  ;;  %v635_v18 = vsub.f32 %v1002_v38, %v1009_v41  ;;  %v338_v49 = vsub.f32 1.0, %v337_v42  ;;  %v644_v50 = vadd.f32 %v643_v37, %v1013_v43 }
  0x25   :  { %v345_v52 = vadd.f32 %v344_v47, %v343_v46  ;;  %v349_v55 = vmul.f32 %v331_v12, %v331_v12  ;;  %v347_v57 = vadd.f32 %v340_v26, %v339_v24  ;;  %v502_v60 = vsub.f32 %v500_v29, %v501_v35 }
  0x26   :  { %v636_v53 = vmul.f32 2.0, %v635_v18  ;;  %v645_v54 = vmul.f32 2.0, %v644_v50  ;;  %v506_v0 = vadd.f32 %v501_v35, %v500_v29  ;;  %v647_v1 = vmul.f32 %v997_v33, %v993_v31 }
  0x27   :  { %366 = vperm.xlu0 %804, %v338_v49   ;;  %547 = vperm.xlu1 %805, %v499_v48   ;;  %v346_v56 = vmul.f32 2.0, %v345_v52  ;;  %v350_v58 = vadd.f32 %v349_v55, %v335_v21  ;;  %v348_v61 = vmul.f32 2.0, %v347_v57  ;;  %v503_v63 = vmul.f32 2.0, %v502_v60  ;;  %v1083_v60 = vld [vmem:[%s1304_s2 + $0x20] sm:$0xff] }
  0x28   :  { %v646_v59 = vsub.f32 1.0, %v645_v54  ;;  %v648_v2 = vmul.f32 %v990_v30, %v987_v28  ;;  %v355_v4 = vsub.f32 %v970_v17, %v972_v19  ;;  %v507_v5 = vmul.f32 2.0, %v506_v0 }
  0x29   :  { %v351_v62 = vmul.f32 2.0, %v350_v58  ;;  %v628_v7 = vmul.f32 %v993_v31, %v993_v31  ;;  %v357_v9 = vsub.f32 %v343_v46, %v344_v47  ;;  %v361_v10 = vadd.f32 %v349_v55, %v974_v20 }
  0x2a   :  { %v649_v6 = vsub.f32 %v647_v1, %v648_v2  ;;  %v356_v8 = vmul.f32 2.0, %v355_v4  ;;  %v481_v11 = vmul.f32 %v1019_v45, %v1019_v45  ;;  %v653_v13 = vadd.f32 %v648_v2, %v647_v1 }
  0x2b   :  { %373 = vperm.xlu0 %804, %v342_v51   ;;  %667 = vperm.xlu1 %805, %v636_v53   ;;  %v352_v3 = vsub.f32 1.0, %v351_v62  ;;  %v655_v14 = vadd.f32 %v643_v37, %v628_v7  ;;  %v358_v17 = vmul.f32 2.0, %v357_v9  ;;  %v362_v19 = vmul.f32 2.0, %v361_v10 }
  0x2c   :  { %v650_v12 = vmul.f32 2.0, %v649_v6  ;;  %v483_v21 = vadd.f32 %v978_v22, %v481_v11  ;;  %v654_v25 = vmul.f32 2.0, %v653_v13  ;;  %v486_v20 = vmul.f32 %v1019_v45, %v966_v15 }
  0x2d   :  { %v656_v24 = vmul.f32 2.0, %v655_v14  ;;  %v363_v26 = vsub.f32 1.0, %v362_v19  ;;  %v487_v32 = vmul.f32 %v968_v16, %v1016_v44  ;;  %v630_v40 = vadd.f32 %v1013_v43, %v628_v7 }
  0x2e   :  { %v484_v27 = vmul.f32 2.0, %v483_v21  ;;  %v641_v48 = vadd.f32 %v1009_v41, %v1002_v38  ;;  %v490_v18 = vmul.f32 %v968_v16, %v966_v15  ;;  %v491_v49 = vmul.f32 %v1019_v45, %v1016_v44 }
  0x2f   :  { %382 = vperm.xlu0 %804, %v346_v56   ;;  %694 = vperm.xlu1 %805, %v646_v59   ;;  %v657_v34 = vsub.f32 1.0, %v656_v24  ;;  %v488_v37 = vsub.f32 %v486_v20, %v487_v32  ;;  %v494_v39 = vadd.f32 %v487_v32, %v486_v20  ;;  %v631_v46 = vmul.f32 2.0, %v630_v40 }
  0x30   :  { %v485_v36 = vsub.f32 1.0, %v484_v27  ;;  %v642_v50 = vmul.f32 2.0, %v641_v48  ;;  %v492_v51 = vadd.f32 %v491_v49, %v490_v18  ;;  %v504_v43 = vsub.f32 %v490_v18, %v491_v49  ;;  %v1127_v18 = vld [vmem:[%s1305_s3] sm:$0xff] }
  0x31   :  { %v489_v22 = vmul.f32 2.0, %v488_v37  ;;  %v495_v42 = vmul.f32 2.0, %v494_v39  ;;  %v632_v47 = vsub.f32 1.0, %v631_v46  ;;  %v637_v53 = vmul.f32 %v997_v33, %v990_v30  ;;  %v1074_v33 = vld [vmem:[%s1304_s2 + $0x8] sm:$0xff] }
  0x32   :  { %v493_v52 = vmul.f32 2.0, %v492_v51  ;;  %v638_v54 = vmul.f32 %v993_v31, %v987_v28  ;;  %v505_v38 = vmul.f32 2.0, %v504_v43  ;;  %v508_v44 = vadd.f32 %v982_v23, %v481_v11  ;;  %v1059_v28 = vld [vmem:[%s1304_s2 + $0x10] sm:$0xff]  ;;  %v1064_v31 = vld [vmem:[%s1304_s2 + $0x18] sm:$0xff]  ;;  %v1069_v23 = vld [vmem:[%s1304_s2] sm:$0xff] }
  0x33   :  { %393 = vperm.xlu0 %804, %v348_v61   ;;  %556 = vperm.xlu1 %805, %v503_v63   ;;  %v1088_v61 = vld [vmem:[%s1304_s2 + $0x28] sm:$0xff]  ;;  %v40_v10 = vlaneseq }
  0x34   :  { %v639_v41 = vadd.f32 %v638_v54, %v637_v53  ;;  %v651_v16 = vsub.f32 %v637_v53, %v638_v54  ;;  %v509_v29 = vmul.f32 2.0, %v508_v44  ;;  %v1132_v53 = vld [vmem:[%s1305_s3 + $0x8] sm:$0xff]  ;;  %v1137_v54 = vld [vmem:[%s1305_s3 + $0x10] sm:$0xff] }
  0x36   :  { %v640_v15 = vmul.f32 2.0, %v639_v41  ;;  %v652_v45 = vmul.f32 2.0, %v651_v16  ;;  %v510_v35 = vsub.f32 1.0, %v509_v29  ;;  %v1156_v29 = vld [vmem:[%s1305_s3 + $0x28] sm:$0xff] }
  0x37   :  { %400 = vperm.xlu0 %804, %v352_v3   ;;  %574 = vperm.xlu1 %805, %v507_v5  }
  0x3b   :  { %409 = vperm.xlu0 %804, %v356_v8   ;;  %703 = vperm.xlu1 %805, %v650_v12  }
  0x3f   :  { %420 = vperm.xlu0 %804, %v358_v17   ;;  %721 = vperm.xlu1 %805, %v654_v25   ;;  %v1104_v17 = vshrl.u32 %v40_v10, 7 }
  0x41   :  { %vm44_vm0 = vcmp.lt.s32.totalorder %v1104_v17, 2 }
  0x43   :  { %436 = vperm.xlu0 %804, %v363_v26   ;;  %730 = vperm.xlu1 %805, %v657_v34  }
  0x47   :  { %513 = vperm.xlu0 %804, %v485_v36  }
  0x4b   :  { %520 = vperm.xlu0 %804, %v489_v22  }
  0x4f   :  { %540 = vperm.xlu0 %804, %v495_v42  }
  0x53   :  { %660 = vperm.xlu0 %804, %v632_v47  }
  0x57   :  { %687 = vperm.xlu0 %804, %v642_v50  }
  0x5b   :  { %529 = vperm.xlu0 %804, %v493_v52  }
  0x5f   :  { %567 = vperm.xlu0 %804, %v505_v38   ;;  %v1142_v38 = vld [vmem:[%s1305_s3 + $0x18] sm:$0xff] }
  0x63   :  { %676 = vperm.xlu0 %804, %v640_v15  }
  0x67   :  { %714 = vperm.xlu0 %804, %v652_v45   ;;  %v1151_v45 = vld [vmem:[%s1305_s3 + $0x20] sm:$0xff] }
  0x6b   :  { %583 = vperm.xlu0 %804, %v510_v35  }
  0x81   :  { %v69_v55 = vpop.permute.xlu0 %68  ;;  %v85_v30 = vpop.permute.xlu1 %84 }
  0x82   :  { %v71_v62 = vmul.f32 %v69_v55, %v1069_v23  ;;  %v72_v63 = vmul.f32 %v69_v55, %v1074_v33  ;;  %v87_v1 = vmul.f32 %v1083_v60, %v85_v30  ;;  %v88_v2 = vmul.f32 %v1088_v61, %v85_v30 }
  0x85   :  { %v76_v56 = vpop.permute.xlu0 %75  ;;  %v94_v0 = vpop.permute.xlu1 %93 }
  0x86   :  { %v78_v57 = vmul.f32 %v1059_v28, %v76_v56  ;;  %v79_v58 = vmul.f32 %v1064_v31, %v76_v56 }
  0x88   :  { %v80_v3 = vadd.f32 %v78_v57, %v71_v62  ;;  %v81_v4 = vadd.f32 %v79_v58, %v72_v63 }
  0x89   :  { %v1078_v59 = vpop.permute.xlu0 %156  ;;  %v1096_v8 = vpop.permute.xlu1 %244 }
  0x8a   :  { %v89_v6 = vadd.f32 %v87_v1, %v80_v3  ;;  %v90_v7 = vadd.f32 %v88_v2, %v81_v4  ;;  %v159_v19 = vmul.f32 %v1078_v59, %v1069_v23  ;;  %v160_v21 = vmul.f32 %v1078_v59, %v1074_v33 }
  0x8b   :  { %v247_v27 = vmul.f32 %v1096_v8, %v1069_v23  ;;  %v248_v20 = vmul.f32 %v1096_v8, %v1074_v33 }
  0x8c   :  { %v96_v13 = vadd.f32 %v94_v0, %v89_v6  ;;  %v97_v14 = vadd.f32 %v94_v0, %v90_v7 }
  0x8d   :  { %v1094_v5 = vpop.permute.xlu0 %163  ;;  %v1118_v32 = vpop.permute.xlu1 %251 }
  0x8e   :  { %v166_v11 = vmul.f32 %v1059_v28, %v1094_v5  ;;  %v167_v12 = vmul.f32 %v1064_v31, %v1094_v5  ;;  %v254_v37 = vmul.f32 %v1059_v28, %v1118_v32  ;;  %v255_v22 = vmul.f32 %v1064_v31, %v1118_v32 }
  0x90   :  { %v168_v39 = vadd.f32 %v166_v11, %v159_v19  ;;  %v169_v40 = vadd.f32 %v167_v12, %v160_v21  ;;  %v256_v0 = vadd.f32 %v254_v37, %v247_v27  ;;  %v257_v11 = vadd.f32 %v255_v22, %v248_v20 }
  0x91   :  { %v1098_v9 = vpop.permute.xlu0 %172 }
  0x92   :  { %v175_v24 = vmul.f32 %v1083_v60, %v1098_v9  ;;  %v176_v26 = vmul.f32 %v1088_v61, %v1098_v9 }
  0x94   :  { %v177_v51 = vadd.f32 %v175_v24, %v168_v39  ;;  %v178_v52 = vadd.f32 %v176_v26, %v169_v40 }
  0x96   :  { %v101_v25 = vpop.permute.xlu0 %100 }
  0x97   :  { %v103_v34 = vmul.f32 %v101_v25, %v96_v13  ;;  %v104_v36 = vmul.f32 %v101_v25, %v97_v14 }
  0x99   :  { %v105_v42 = vmul.f32 %v103_v34, %v69_v55  ;;  %v106_v46 = vmul.f32 %v104_v36, %v69_v55  ;;  %v111_v47 = vmul.f32 %v103_v34, %v76_v56  ;;  %v112_v48 = vmul.f32 %v104_v36, %v76_v56 }
  0x9a   :  { %v117_v49 = vmul.f32 %v103_v34, %v85_v30  ;;  %v118_v50 = vmul.f32 %v104_v36, %v85_v30  ;;  %v182_v43 = vpop.permute.xlu0 %181 }
  0x9b   :  { %v107_v41 = vsub.f32 %v1069_v23, %v105_v42  ;;  %v108_v15 = vsub.f32 %v1074_v33, %v106_v46  ;;  %v113_v16 = vsub.f32 %v1059_v28, %v111_v47  ;;  %v114_v44 = vsub.f32 %v1064_v31, %v112_v48  ;;  %v270_v42 = vpop.permute.xlu1 %269 }
  0x9c   :  { %v119_v35 = vsub.f32 %v1083_v60, %v117_v49  ;;  %v120_v55 = vsub.f32 %v1088_v61, %v118_v50  ;;  %v184_v56 = vadd.f32 %v182_v43, %v177_v51  ;;  %v185_v30 = vadd.f32 %v182_v43, %v178_v52 }
  0x9d   :  { %v109_v57 = vsub.f32 %v107_v41, %v1127_v18  ;;  %v110_v58 = vsub.f32 %v108_v15, %v1132_v53  ;;  %v115_v62 = vsub.f32 %v113_v16, %v1137_v54  ;;  %v116_v63 = vsub.f32 %v114_v44, %v1142_v38 }
  0x9e   :  { %v189_v1 = vpop.permute.xlu0 %188  ;;  %v121_v2 = vsub.f32 %v119_v35, %v1151_v45  ;;  %v122_v3 = vsub.f32 %v120_v55, %v1156_v29  ;;  %v819_v47 = vmov 0.0  }
  0x9f   :  { %v191_v4 = vmul.f32 %v189_v1, %v184_v56  ;;  %v192_v6 = vmul.f32 %v189_v1, %v185_v30  ;;  %v123_v7 = vmul.f32 %v109_v57, %v109_v57  ;;  %v124_v10 = vmul.f32 %v110_v58, %v110_v58 }
  0xa0   :  { %v125_v12 = vmul.f32 %v115_v62, %v115_v62  ;;  %v126_v13 = vmul.f32 %v116_v63, %v116_v63  ;;  %v129_v14 = vmul.f32 %v121_v2, %v121_v2  ;;  %v130_v40 = vmul.f32 %v122_v3, %v122_v3  ;;  %v277_v62 = vpop.permute.xlu1 %276 }
  0xa1   :  { %v193_v19 = vmul.f32 %v191_v4, %v1078_v59  ;;  %v194_v21 = vmul.f32 %v192_v6, %v1078_v59  ;;  %v199_v25 = vmul.f32 %v191_v4, %v1094_v5  ;;  %v200_v24 = vmul.f32 %v192_v6, %v1094_v5 }
  0xa2   :  { %v205_v26 = vmul.f32 %v191_v4, %v1098_v9  ;;  %v206_v27 = vmul.f32 %v192_v6, %v1098_v9  ;;  %v261_v34 = vpop.permute.xlu0 %260  ;;  %v127_v36 = vadd.f32 %v125_v12, %v123_v7  ;;  %v128_v37 = vadd.f32 %v126_v13, %v124_v10 }
  0xa3   :  { %v195_v20 = vsub.f32 %v1069_v23, %v193_v19  ;;  %v196_v22 = vsub.f32 %v1074_v33, %v194_v21  ;;  %v201_v39 = vsub.f32 %v1059_v28, %v199_v25  ;;  %v202_v59 = vsub.f32 %v1064_v31, %v200_v24 }
  0xa4   :  { %v207_v46 = vsub.f32 %v1083_v60, %v205_v26  ;;  %v208_v5 = vsub.f32 %v1088_v61, %v206_v27  ;;  %v1181_v9 = vsel %vm44_vm0, 1.0, %v819_v47  ;;  %v263_v48 = vmul.f32 %v1083_v60, %v261_v34 }
  0xa5   :  { %v264_v49 = vmul.f32 %v1088_v61, %v261_v34  ;;  %v131_v50 = vadd.f32 %v129_v14, %v127_v36  ;;  %v132_v51 = vadd.f32 %v130_v40, %v128_v37  ;;  %v197_v43 = vsub.f32 %v195_v20, %v1127_v18 }
  0xa6   :  { %v1185_v52 = vpop.permute.xlu0 %366  ;;  %v198_v41 = vsub.f32 %v196_v22, %v1132_v53  ;;  %v203_v15 = vsub.f32 %v201_v39, %v1137_v54  ;;  %v265_v16 = vadd.f32 %v263_v48, %v256_v0  ;;  %v204_v55 = vsub.f32 %v202_v59, %v1142_v38  ;;  %v428_v59 = vpop.permute.xlu1 %427 }
  0xa7   :  { %v266_v44 = vadd.f32 %v264_v49, %v257_v11  ;;  %v133_v17 = vmul.f32 %v1181_v9, %v131_v50  ;;  %v134_v35 = vmul.f32 %v1181_v9, %v132_v51  ;;  %v209_v57 = vsub.f32 %v207_v46, %v1151_v45 }
  0xa8   :  { %v272_v56 = vadd.f32 %v270_v42, %v265_v16  ;;  %v210_v58 = vsub.f32 %v208_v5, %v1156_v29  ;;  %v211_v2 = vmul.f32 %v197_v43, %v197_v43  ;;  %v212_v3 = vmul.f32 %v198_v41, %v198_v41 }
  0xa9   :  { %v273_v30 = vadd.f32 %v270_v42, %v266_v44  ;;  %v135_v63 = vadd.f32 %v134_v35, %v133_v17  ;;  %v213_v4 = vmul.f32 %v203_v15, %v203_v15  ;;  %v214_v7 = vmul.f32 %v204_v55, %v204_v55 }
  0xaa   :  { %v374_v1 = vpop.permute.xlu0 %373  ;;  %v279_v0 = vmul.f32 %v277_v62, %v272_v56  ;;  %v217_v14 = vmul.f32 %v209_v57, %v209_v57  ;;  %v218_v19 = vmul.f32 %v210_v58, %v210_v58  ;;  %v1219_v57 = vpop.permute.xlu1 %547  ;;  %v369_v58 = vmul.f32 %v1185_v52, %v1069_v23 }
  0xab   :  { %v280_v6 = vmul.f32 %v277_v62, %v273_v30  ;;  %136 = vadd.xlane.f32.xlu1 %v135_v63  ;;  %v215_v10 = vadd.f32 %v213_v4, %v211_v2  ;;  %v216_v13 = vadd.f32 %v214_v7, %v212_v3  ;;  %v376_v47 = vmul.f32 %v1059_v28, %v374_v1 }
  0xac   :  { %v293_v11 = vmul.f32 %v279_v0, %v261_v34  ;;  %v281_v21 = vmul.f32 %v279_v0, %v1096_v8  ;;  %v287_v40 = vmul.f32 %v279_v0, %v1118_v32  ;;  %v370_v62 = vmul.f32 %v1185_v52, %v1074_v33 }
  0xad   :  { %v294_v25 = vmul.f32 %v280_v6, %v261_v34  ;;  %v219_v24 = vadd.f32 %v217_v14, %v215_v10  ;;  %v220_v26 = vadd.f32 %v218_v19, %v216_v13  ;;  %v282_v36 = vmul.f32 %v280_v6, %v1096_v8 }
  0xae   :  { %v383_v12 = vpop.permute.xlu0 %382  ;;  %v295_v27 = vsub.f32 %v1083_v60, %v293_v11  ;;  %v283_v37 = vsub.f32 %v1069_v23, %v281_v21  ;;  %v288_v42 = vmul.f32 %v280_v6, %v1118_v32  ;;  %v377_v8 = vmul.f32 %v1064_v31, %v374_v1 }
  0xaf   :  { %v221_v20 = vmul.f32 %v1181_v9, %v219_v24  ;;  %v222_v22 = vmul.f32 %v1181_v9, %v220_v26  ;;  %v296_v34 = vsub.f32 %v1088_v61, %v294_v25  ;;  %v284_v5 = vsub.f32 %v1074_v33, %v282_v36 }
  0xb0   :  { %v285_v48 = vsub.f32 %v283_v37, %v1127_v18  ;;  %v289_v49 = vsub.f32 %v1059_v28, %v287_v40  ;;  %v290_v43 = vsub.f32 %v1064_v31, %v288_v42  ;;  %v297_v41 = vsub.f32 %v295_v27, %v1151_v45 }
  0xb1   :  { %v223_v46 = vadd.f32 %v222_v22, %v221_v20  ;;  %v286_v32 = vsub.f32 %v284_v5, %v1132_v53  ;;  %v298_v56 = vsub.f32 %v296_v34, %v1156_v29  ;;  %v385_v63 = vmul.f32 %v1083_v60, %v383_v12  ;;  %v668_v20 = vpop.permute.xlu1 %667 }
  0xb2   :  { %v394_v39 = vpop.permute.xlu0 %393  ;;  %v291_v44 = vsub.f32 %v289_v49, %v1137_v54  ;;  %v299_v17 = vmul.f32 %v285_v48, %v285_v48  ;;  %v292_v55 = vsub.f32 %v290_v43, %v1142_v38  ;;  %v386_v2 = vmul.f32 %v1088_v61, %v383_v12 }
  0xb3   :  { %224 = vadd.xlane.f32.xlu0 %v223_v46  ;;  %v396_v50 = vmul.f32 %v394_v39, %v1069_v23  ;;  %v397_v35 = vmul.f32 %v394_v39, %v1074_v33  ;;  %v300_v30 = vmul.f32 %v286_v32, %v286_v32  ;;  %v305_v13 = vmul.f32 %v297_v41, %v297_v41 }
  0xb4   :  { %v301_v1 = vmul.f32 %v291_v44, %v291_v44  ;;  %v302_v6 = vmul.f32 %v292_v55, %v292_v55  ;;  %v378_v14 = vadd.f32 %v376_v47, %v369_v58  ;;  %v379_v19 = vadd.f32 %v377_v8, %v370_v62 }
  0xb5   :  { %v306_v25 = vmul.f32 %v298_v56, %v298_v56  ;;  %v430_v34 = vmul.f32 %v1059_v28, %v428_v59  ;;  %v431_v46 = vmul.f32 %v1064_v31, %v428_v59 }
  0xb6   :  { %v401_v51 = vpop.permute.xlu0 %400  ;;  %v303_v11 = vadd.f32 %v301_v1, %v299_v17  ;;  %v304_v21 = vadd.f32 %v302_v6, %v300_v30  ;;  %v387_v27 = vadd.f32 %v385_v63, %v378_v14  ;;  %v388_v36 = vadd.f32 %v386_v2, %v379_v19 }
  0xb7   :  { %v403_v15 = vmul.f32 %v1059_v28, %v401_v51  ;;  %v404_v16 = vmul.f32 %v1064_v31, %v401_v51 }
  0xb8   :  { %v307_v26 = vadd.f32 %v305_v13, %v303_v11  ;;  %v308_v12 = vadd.f32 %v306_v25, %v304_v21  ;;  %v389_v8 = vsub.f32 %v387_v27, %v1127_v18  ;;  %v390_v48 = vsub.f32 %v388_v36, %v1132_v53 }
  0xb9   :  { %v405_v3 = vadd.f32 %v403_v15, %v396_v50  ;;  %v406_v4 = vadd.f32 %v404_v16, %v397_v35  ;;  %v695_v15 = vpop.permute.xlu1 %694  ;;  %v670_v27 = vmul.f32 %v1059_v28, %v668_v20  ;;  %v671_v36 = vmul.f32 %v1064_v31, %v668_v20 }
  0xba   :  { %v410_v0 = vpop.permute.xlu0 %409  ;;  %v309_v22 = vmul.f32 %v1181_v9, %v307_v26  ;;  %v310_v40 = vmul.f32 %v1181_v9, %v308_v12  ;;  %v445_v55 = vmul.f32 %v389_v8, %v389_v8  ;;  %v446_v56 = vmul.f32 %v390_v48, %v390_v48 }
  0xbb   :  { %v412_v7 = vmul.f32 %v1083_v60, %v410_v0  ;;  %v413_v10 = vmul.f32 %v1088_v61, %v410_v0  ;;  %v551_v26 = vmul.f32 %v1064_v31, %v1219_v57  ;;  %v697_v12 = vmul.f32 %v1059_v28, %v695_v15 }
  0xbc   :  { %v311_v49 = vadd.f32 %v310_v40, %v309_v22 }
  0xbd   :  { %v414_v52 = vadd.f32 %v412_v7, %v405_v3  ;;  %v415_v24 = vadd.f32 %v413_v10, %v406_v4  ;;  %v557_v4 = vpop.permute.xlu1 %556 }
  0xbe   :  { %v421_v37 = vpop.permute.xlu0 %420  ;;  %312 = vadd.xlane.f32.xlu1 %v311_v49  ;;  %v559_v40 = vmul.f32 %v1083_v60, %v557_v4 }
  0xbf   :  { %v423_v39 = vmul.f32 %v421_v37, %v1069_v23  ;;  %v424_v42 = vmul.f32 %v421_v37, %v1074_v33  ;;  %v416_v5 = vsub.f32 %v414_v52, %v1137_v54  ;;  %v417_v47 = vsub.f32 %v415_v24, %v1142_v38 }
  0xc0   :  { %v550_v24 = vmul.f32 %v1059_v28, %v1219_v57  ;;  %v698_v37 = vmul.f32 %v1064_v31, %v695_v15 }
  0xc1   :  { %v432_v51 = vadd.f32 %v430_v34, %v423_v39  ;;  %v433_v32 = vadd.f32 %v431_v46, %v424_v42  ;;  %v447_v16 = vmul.f32 %v416_v5, %v416_v5  ;;  %v448_v59 = vmul.f32 %v417_v47, %v417_v47  ;;  %v575_v14 = vpop.permute.xlu1 %574 }
  0xc2   :  { %v437_v50 = vpop.permute.xlu0 %436  ;;  %v560_v42 = vmul.f32 %v1088_v61, %v557_v4  ;;  %v577_v5 = vmul.f32 %v1059_v28, %v575_v14  ;;  %v578_v20 = vmul.f32 %v1064_v31, %v575_v14 }
  0xc3   :  { %v439_v43 = vmul.f32 %v1083_v60, %v437_v50  ;;  %v440_v41 = vmul.f32 %v1088_v61, %v437_v50  ;;  %v449_v1 = vadd.f32 %v447_v16, %v445_v55  ;;  %v450_v2 = vadd.f32 %v448_v59, %v446_v56 }
  0xc5   :  { %v441_v44 = vadd.f32 %v439_v43, %v432_v51  ;;  %v442_v17 = vadd.f32 %v440_v41, %v433_v32  ;;  %v704_v25 = vpop.permute.xlu1 %703 }
  0xc6   :  { %v514_v35 = vpop.permute.xlu0 %513  ;;  %v706_v59 = vmul.f32 %v1083_v60, %v704_v25 }
  0xc7   :  { %v443_v30 = vsub.f32 %v441_v44, %v1151_v45  ;;  %v444_v58 = vsub.f32 %v442_v17, %v1156_v29  ;;  %v516_v49 = vmul.f32 %v514_v35, %v1069_v23  ;;  %v517_v50 = vmul.f32 %v514_v35, %v1074_v33 }
  0xc8   :  { %v707_v44 = vmul.f32 %v1088_v61, %v704_v25 }
  0xc9   :  { %v451_v62 = vmul.f32 %v443_v30, %v443_v30  ;;  %v452_v63 = vmul.f32 %v444_v58, %v444_v58  ;;  %v722_v34 = vpop.permute.xlu1 %721 }
  0xca   :  { %v521_v3 = vpop.permute.xlu0 %520  ;;  %v724_v56 = vmul.f32 %v1059_v28, %v722_v34  ;;  %v725_v35 = vmul.f32 %v1064_v31, %v722_v34 }
  0xcb   :  { %v453_v0 = vadd.f32 %v451_v62, %v449_v1  ;;  %v454_v6 = vadd.f32 %v452_v63, %v450_v2  ;;  %v523_v47 = vmul.f32 %v1059_v28, %v521_v3  ;;  %v524_v8 = vmul.f32 %v1064_v31, %v521_v3 }
  0xcd   :  { %v455_v7 = vmul.f32 %v1181_v9, %v453_v0  ;;  %v456_v10 = vmul.f32 %v1181_v9, %v454_v6  ;;  %v525_v30 = vadd.f32 %v523_v47, %v516_v49  ;;  %v526_v58 = vadd.f32 %v524_v8, %v517_v50  ;;  %v731_v63 = vpop.permute.xlu1 %730 }
  0xce   :  { %v541_v11 = vpop.permute.xlu0 %540  ;;  %v733_v31 = vmul.f32 %v1083_v60, %v731_v63 }
  0xcf   :  { %v457_v13 = vadd.f32 %v456_v10, %v455_v7  ;;  %v543_v46 = vmul.f32 %v541_v11, %v1069_v23  ;;  %v544_v57 = vmul.f32 %v541_v11, %v1074_v33 }
  0xd1   :  { %458 = vadd.xlane.f32.xlu0 %v457_v13  ;;  %v552_v17 = vadd.f32 %v550_v24, %v543_v46  ;;  %v553_v55 = vadd.f32 %v551_v26, %v544_v57 }
  0xd2   :  { %v661_v19 = vpop.permute.xlu0 %660 }
  0xd3   :  { %v663_v51 = vmul.f32 %v661_v19, %v1069_v23  ;;  %v664_v32 = vmul.f32 %v661_v19, %v1074_v33  ;;  %v561_v11 = vadd.f32 %v559_v40, %v552_v17  ;;  %v562_v13 = vadd.f32 %v560_v42, %v553_v55 }
  0xd4   :  { %v734_v19 = vmul.f32 %v1088_v61, %v731_v63 }
  0xd5   :  { %v672_v1 = vadd.f32 %v670_v27, %v663_v51  ;;  %v673_v2 = vadd.f32 %v671_v36, %v664_v32  ;;  %v563_v40 = vsub.f32 %v561_v11, %v1137_v54  ;;  %v564_v42 = vsub.f32 %v562_v13, %v1142_v38 }
  0xd6   :  { %v688_v21 = vpop.permute.xlu0 %687 }
  0xd7   :  { %v690_v22 = vmul.f32 %v688_v21, %v1069_v23  ;;  %v691_v39 = vmul.f32 %v688_v21, %v1074_v33 }
  0xd9   :  { %v699_v43 = vadd.f32 %v697_v12, %v690_v22  ;;  %v700_v41 = vadd.f32 %v698_v37, %v691_v39 }
  0xda   :  { %v530_v52 = vpop.permute.xlu0 %529 }
  0xdb   :  { %v532_v15 = vmul.f32 %v1083_v60, %v530_v52  ;;  %v533_v16 = vmul.f32 %v1088_v61, %v530_v52  ;;  %v708_v0 = vadd.f32 %v706_v59, %v699_v43  ;;  %v709_v6 = vadd.f32 %v707_v44, %v700_v41 }
  0xdd   :  { %v534_v7 = vadd.f32 %v532_v15, %v525_v30  ;;  %v535_v10 = vadd.f32 %v533_v16, %v526_v58  ;;  %v710_v12 = vsub.f32 %v708_v0, %v1137_v54  ;;  %v711_v37 = vsub.f32 %v709_v6, %v1142_v38 }
  0xde   :  { %v568_v48 = vpop.permute.xlu0 %567  ;;  %v595_v15 = vmul.f32 %v564_v42, %v564_v42 }
  0xdf   :  { %v570_v21 = vmul.f32 %v568_v48, %v1069_v23  ;;  %v571_v25 = vmul.f32 %v568_v48, %v1074_v33  ;;  %v536_v22 = vsub.f32 %v534_v7, %v1127_v18  ;;  %v537_v39 = vsub.f32 %v535_v10, %v1132_v53 }
  0xe0   :  { %v742_v32 = vmul.f32 %v711_v37, %v711_v37 }
  0xe1   :  { %v579_v57 = vadd.f32 %v577_v5, %v570_v21  ;;  %v580_v47 = vadd.f32 %v578_v20, %v571_v25  ;;  %v593_v43 = vmul.f32 %v537_v39, %v537_v39  ;;  %v594_v20 = vmul.f32 %v563_v40, %v563_v40 }
  0xe2   :  { %v677_v62 = vpop.permute.xlu0 %676 }
  0xe3   :  { %v679_v3 = vmul.f32 %v1083_v60, %v677_v62  ;;  %v680_v4 = vmul.f32 %v1088_v61, %v677_v62 }
  0xe5   :  { %v681_v14 = vadd.f32 %v679_v3, %v672_v1  ;;  %v682_v28 = vadd.f32 %v680_v4, %v673_v2 }
  0xe6   :  { %v715_v52 = vpop.permute.xlu0 %714 }
  0xe7   :  { %v683_v24 = vsub.f32 %v681_v14, %v1127_v18  ;;  %v684_v26 = vsub.f32 %v682_v28, %v1132_v53  ;;  %v717_v27 = vmul.f32 %v715_v52, %v1069_v23  ;;  %v718_v36 = vmul.f32 %v715_v52, %v1074_v33 }
  0xe8   :  { %v741_v18 = vmul.f32 %v710_v12, %v710_v12  ;;  %v592_v53 = vmul.f32 %v536_v22, %v536_v22 }
  0xe9   :  { %v726_v34 = vadd.f32 %v724_v56, %v717_v27  ;;  %v727_v46 = vadd.f32 %v725_v35, %v718_v36  ;;  %v739_v8 = vmul.f32 %v683_v24, %v683_v24  ;;  %v740_v23 = vmul.f32 %v684_v26, %v684_v26 }
  0xea   :  { %v584_v48 = vpop.permute.xlu0 %583  ;;  %v596_v55 = vadd.f32 %v594_v20, %v592_v53  ;;  %v597_v56 = vadd.f32 %v595_v15, %v593_v43 }
  0xeb   :  { %v735_v33 = vadd.f32 %v733_v31, %v726_v34  ;;  %v736_v49 = vadd.f32 %v734_v19, %v727_v46  ;;  %v586_v50 = vmul.f32 %v1083_v60, %v584_v48  ;;  %v587_v51 = vmul.f32 %v1088_v61, %v584_v48 }
  0xec   :  { %v743_v16 = vadd.f32 %v741_v18, %v739_v8  ;;  %v744_v59 = vadd.f32 %v742_v32, %v740_v23 }
  0xed   :  { %v737_v54 = vsub.f32 %v735_v33, %v1151_v45  ;;  %v738_v38 = vsub.f32 %v736_v49, %v1156_v29  ;;  %v588_v41 = vadd.f32 %v586_v50, %v579_v57  ;;  %v589_v5 = vadd.f32 %v587_v51, %v580_v47 }
  0xef   :  { %v590_v44 = vsub.f32 %v588_v41, %v1151_v45  ;;  %v591_v60 = vsub.f32 %v589_v5, %v1156_v29  ;;  %v745_v17 = vmul.f32 %v737_v54, %v737_v54  ;;  %v746_v61 = vmul.f32 %v738_v38, %v738_v38 }
  0xf1   :  { %v598_v35 = vmul.f32 %v590_v44, %v590_v44  ;;  %v599_v30 = vmul.f32 %v591_v60, %v591_v60  ;;  %v747_v58 = vadd.f32 %v745_v17, %v743_v16  ;;  %v748_v62 = vadd.f32 %v746_v61, %v744_v59 }
  0xf3   :  { %v749_v63 = vmul.f32 %v1181_v9, %v747_v58  ;;  %v750_v1 = vmul.f32 %v1181_v9, %v748_v62  ;;  %v600_v2 = vadd.f32 %v598_v35, %v596_v55  ;;  %v601_v3 = vadd.f32 %v599_v30, %v597_v56 }
  0xf5   :  { %v751_v4 = vadd.f32 %v750_v1, %v749_v63  ;;  %v602_v0 = vmul.f32 %v1181_v9, %v600_v2  ;;  %v603_v45 = vmul.f32 %v1181_v9, %v601_v3 }
  0xf7   :  { %752 = vadd.xlane.f32.xlu0 %v751_v4  ;;  %v604_v29 = vadd.f32 %v603_v45, %v602_v0 }
  0xf9   :  { %605 = vadd.xlane.f32.xlu1 %v604_v29 }
 0x138   :  { %v137_v6 = vpop.xlane.xlu1 %136 }
 0x140   :  { %v225_v7 = vpop.xlane.xlu0 %224 }
 0x141   :  { %v755_v13 = vsel %vm754_vm1, %v137_v6, %v225_v7 }
 0x14b   :  { %v313_v10 = vpop.xlane.xlu1 %312 }
 0x14c   :  { %v757_v14 = vsel %vm756_vm2, %v755_v13, %v313_v10 }
 0x15e   :  { %v459_v11 = vpop.xlane.xlu0 %458 }
 0x15f   :  { %v759_v28 = vsel %vm758_vm3, %v757_v14, %v459_v11 }
 0x184   :  { %v753_v19 = vpop.xlane.xlu0 %752 }
 0x186   :  { %v606_v31 = vpop.xlane.xlu1 %605 }
 0x187   :  { %v761_v21 = vsel %vm760_vm4, %v759_v28, %v606_v31 }
 0x188   :  { %v763_v9 = vsel %vm762_vm5, %v761_v21, %v753_v19 }
 0x189   :  { %765 = vst.msk [vmem:[%s1306_s4] sm:$0xff] %vm764_vm6, %v763_v9 }

</bundles_post_ra>
